<compile_context>
chip_gen: v5e
topology: v5e:2x2
jax: 0.10.0
libtpu: 0.0.40
codegen_flags: <defaults>
</compile_context>

<pallas_src>
import numpy as np

import jax
import jax.numpy as jnp
from jax import lax
from jax.experimental import pallas as pl
from jax.experimental.pallas import tpu as pltpu


# ----------------------------------------------------------------------------
# Host-side (one-time) parameter preparation
# ----------------------------------------------------------------------------
def _make_banded(w_oihw, W):
    """torch weight (Cout, Cin, 3, 3) -> (3, W*Cin, W*Cout) bf16.

    BW[ky, j*Cin+ci, w*Cout+co] = sum over kx with reflect(w-1+kx)==j of
    w[co, ci, ky, kx]; i.e. the kx taps and the reflection padding along W are
    folded into a block-banded matrix acting on a flattened (W*Cin,) image row.
    """
    w = np.asarray(w_oihw, dtype=np.float32)
    cout, cin, _, _ = w.shape
    mats = np.zeros((3, W * cin, W * cout), np.float32)
    for ky in range(3):
        for col in range(W):
            for kx in range(3):
                j = col - 1 + kx
                if j < 0:
                    j = -j                      # reflect(-1) -> 1
                elif j >= W:
                    j = 2 * W - 2 - j           # reflect(W)  -> W-2
                mats[ky,
                     j * cin:(j + 1) * cin,
                     col * cout:(col + 1) * cout] += w[:, :, ky, kx].T
    return jnp.asarray(mats, dtype=jnp.bfloat16)


def prepare_resblock_params(w1, b1, w2, b2, W):
    """Build banded bf16 conv matrices and W-tiled f32 bias rows."""
    w1b = _make_banded(w1, W)
    w2b = _make_banded(w2, W)
    b1t = jnp.tile(jnp.asarray(b1, jnp.float32), W)[None, :]   # (1, W*C)
    b2t = jnp.tile(jnp.asarray(b2, jnp.float32), W)[None, :]   # (1, W*C)
    return w1b, b1t, w2b, b2t


# ----------------------------------------------------------------------------
# Pallas kernel
# ----------------------------------------------------------------------------
def resblock_kernel(xph_ref, xres_ref, w1_ref, b1_ref, w2_ref, b2_ref,
                    o_ref, pad_ref):
    # xph_ref : (1, H+2, W*C)  bf16  H-reflection-padded input rows (flattened)
    # xres_ref: (1, H,   W*C)  f32   unpadded input (residual), lane-dense
    # w*_ref  : (3, W*C, W*C)  bf16  banded conv matrices (W-reflection folded)
    # b*_ref  : (1, W*C)       f32   W-tiled bias
    # o_ref   : (1, H,   W*C)  f32
    # pad_ref : (H+2, W*C)     f32   VMEM scratch for the H-padded intermediate
    H = o_ref.shape[1]
    WC = o_ref.shape[2]
    f32 = jnp.float32

    xp = xph_ref[0]                                    # (H+2, W*C) bf16

    # ---- conv1: bias folded into accumulator init, 3 lane-dense matmuls ----
    acc = jnp.broadcast_to(b1_ref[...], (H, WC))       # f32
    for ky in range(3):
        acc = acc + jnp.dot(xp[ky:ky + H, :], w1_ref[ky],
                            preferred_element_type=f32)
    out1 = jnp.maximum(acc, 0.0)                       # ReLU in f32

    # ---- reflection pad along H into scratch (W reflection is in w2_ref) ---
    pad_ref[1:H + 1, :] = out1
    pad_ref[0:1, :] = out1[1:2, :]                     # top    = row 1
    pad_ref[H + 1:H + 2, :] = out1[H - 2:H - 1, :]     # bottom = row H-2

    # ---- conv2 -------------------------------------------------------------
    acc2 = jnp.broadcast_to(b2_ref[...], (H, WC))      # f32
    for ky in range(3):
        acc2 = acc2 + jnp.dot(pad_ref[ky:ky + H, :].astype(jnp.bfloat16),
                              w2_ref[ky], preferred_element_type=f32)

    # ---- residual add (aligned, lane-dense, pure VPU) ----------------------
    o_ref[0] = (xres_ref[0] + acc2).astype(o_ref.dtype)


# ----------------------------------------------------------------------------
# Wrapper
# ----------------------------------------------------------------------------
def resblock_pallas(x_nchw, w1b, b1t, w2b, b2t):
    """x_nchw: (N, C, H, W) f32; w*b/b*t from prepare_resblock_params."""
    N, C, H, W = x_nchw.shape
    WC = W * C

    # NCHW -> NHWC; flatten rows to (W*C,) lanes (free row-major reshape).
    x = jnp.transpose(x_nchw, (0, 2, 3, 1))                        # (N,H,W,C)
    x_res = x.reshape(N, H, WC)                                    # f32
    xh = jnp.pad(x, ((0, 0), (1, 1), (0, 0), (0, 0)), mode="reflect")
    xph = xh.reshape(N, H + 2, WC).astype(jnp.bfloat16)            # bf16 DMA

    out = pl.pallas_call(
        resblock_kernel,
        out_shape=jax.ShapeDtypeStruct((N, H, WC), jnp.float32),
        grid_spec=pltpu.PrefetchScalarGridSpec(
            num_scalar_prefetch=0,
            grid=(N,),
            in_specs=[
                pl.BlockSpec((1, H + 2, WC), lambda n: (n, 0, 0)),   # xph
                pl.BlockSpec((1, H, WC), lambda n: (n, 0, 0)),       # x_res
                pl.BlockSpec((3, WC, WC), lambda n: (0, 0, 0)),      # w1b
                pl.BlockSpec((1, WC), lambda n: (0, 0)),             # b1t
                pl.BlockSpec((3, WC, WC), lambda n: (0, 0, 0)),      # w2b
                pl.BlockSpec((1, WC), lambda n: (0, 0)),             # b2t
            ],
            out_specs=pl.BlockSpec((1, H, WC), lambda n: (n, 0, 0)),
            scratch_shapes=[pltpu.VMEM((H + 2, WC), jnp.float32)],
        ),
        compiler_params=pltpu.CompilerParams(
            dimension_semantics=("parallel",),
            vmem_limit_bytes=32 * 1024 * 1024),
    )(xph, x_res, w1b, b1t, w2b, b2t)

    return jnp.transpose(out.reshape(N, H, W, C), (0, 3, 1, 2))     # NCHW


# ----------------------------------------------------------------------------
# Pure-JAX reference (matches the PyTorch module)
# ----------------------------------------------------------------------------
def resblock_reference(x_nchw, w1, b1, w2, b2):
    def refl_pad(x):
        return jnp.pad(x, ((0, 0), (0, 0), (1, 1), (1, 1)), mode="reflect")

    def conv(x, w, b):
        y = lax.conv_general_dilated(
            x, w, window_strides=(1, 1), padding="VALID",
            dimension_numbers=("NCHW", "OIHW", "NCHW"),
            precision=lax.Precision.HIGHEST)
        return y + b.reshape(1, -1, 1, 1)

    out = conv(refl_pad(x_nchw), w1, b1)
    out = jnp.maximum(out, 0.0)
    out = conv(refl_pad(out), w2, b2)
    return x_nchw + out


if __name__ == "__main__":
    key = jax.random.PRNGKey(0)
    k_x, k_w1, k_b1, k_w2, k_b2 = jax.random.split(key, 5)

    N, C, H, W = 2, 16, 16, 16   # internal_channel=16 (module default)

    x = jax.random.normal(k_x, (N, C, H, W), dtype=jnp.float32)
    # deterministic synthetic parameters (shapes of torch.nn.Conv2d(16,16,3))
    w1 = 0.1 * jax.random.normal(k_w1, (C, C, 3, 3), dtype=jnp.float32)
    b1 = 0.1 * jax.random.normal(k_b1, (C,), dtype=jnp.float32)
    w2 = 0.1 * jax.random.normal(k_w2, (C, C, 3, 3), dtype=jnp.float32)
    b2 = 0.1 * jax.random.normal(k_b2, (C,), dtype=jnp.float32)

    # one-time host-side weight repacking (banded bf16 matrices + tiled bias)
    params = prepare_resblock_params(w1, b1, w2, b2, W)

    out = jax.jit(resblock_pallas)(x, *params)
    out = jax.block_until_ready(out)

    ref = resblock_reference(x, w1, b1, w2, b2)
    assert out.shape == (N, C, H, W)
    max_err = float(jnp.max(jnp.abs(out - ref)))
    # bf16 MXU path -> tolerance sized for bf16 rounding of activations/weights
    assert jnp.allclose(out, ref, atol=5e-2, rtol=5e-2), max_err

    print("KERNEL_OK")
</pallas_src>

<mosaic_0001>
module attributes {stable_mosaic.version = 11 : i64} {
  func.func @resblock_kernel(%arg0: i32, %arg1: memref<1x18x256xbf16, #tpu.memory_space<vmem>>, %arg2: memref<1x16x256xf32, #tpu.memory_space<vmem>>, %arg3: memref<3x256x256xbf16, #tpu.memory_space<vmem>>, %arg4: memref<1x256xf32, #tpu.memory_space<vmem>>, %arg5: memref<3x256x256xbf16, #tpu.memory_space<vmem>>, %arg6: memref<1x256xf32, #tpu.memory_space<vmem>>, %arg7: memref<1x16x256xf32, #tpu.memory_space<vmem>>, %arg8: memref<18x256xf32, #tpu.memory_space<vmem>>) attributes {dimension_semantics = [#tpu.dimension_semantics<parallel>], iteration_bounds = array<i64: 2>, scalar_prefetch = 0 : i64, scratch_operands = 1 : i64, tpu.core_type = #tpu.core_type<tc>, window_params = [{transform_indices = @transform_0, window_bounds = array<i64: 1, 18, 256>}, {transform_indices = @transform_1, window_bounds = array<i64: 1, 16, 256>}, {pipeline_mode = #tpu.pipeline_mode<synchronous>, transform_indices = @transform_2, window_bounds = array<i64: 3, 256, 256>}, {pipeline_mode = #tpu.pipeline_mode<synchronous>, transform_indices = @transform_3, window_bounds = array<i64: 1, 256>}, {pipeline_mode = #tpu.pipeline_mode<synchronous>, transform_indices = @transform_4, window_bounds = array<i64: 3, 256, 256>}, {pipeline_mode = #tpu.pipeline_mode<synchronous>, transform_indices = @transform_5, window_bounds = array<i64: 1, 256>}, {transform_indices = @transform_6, window_bounds = array<i64: 1, 16, 256>}]} {
    %c0 = arith.constant 0 : index
    %c0_0 = arith.constant 0 : index
    %c0_1 = arith.constant 0 : index
    %0 = vector.load %arg1[%c0, %c0_0, %c0_1] : memref<1x18x256xbf16, #tpu.memory_space<vmem>>, vector<1x18x256xbf16>
    %1 = vector.shape_cast %0 : vector<1x18x256xbf16> to vector<18x256xbf16>
    %c0_2 = arith.constant 0 : index
    %c0_3 = arith.constant 0 : index
    %2 = vector.load %arg4[%c0_2, %c0_3] : memref<1x256xf32, #tpu.memory_space<vmem>>, vector<1x256xf32>
    %3 = vector.shape_cast %2 : vector<1x256xf32> to vector<1x256xf32>
    %4 = vector.broadcast %3 : vector<1x256xf32> to vector<16x256xf32>
    %5 = vector.extract_strided_slice %1 {offsets = [0, 0], sizes = [16, 256], strides = [1, 1]} : vector<18x256xbf16> to vector<16x256xbf16>
    %c0_4 = arith.constant 0 : index
    %c0_5 = arith.constant 0 : index
    %c0_6 = arith.constant 0 : index
    %6 = vector.load %arg3[%c0_4, %c0_5, %c0_6] : memref<3x256x256xbf16, #tpu.memory_space<vmem>>, vector<1x256x256xbf16>
    %7 = vector.shape_cast %6 : vector<1x256x256xbf16> to vector<256x256xbf16>
    %cst = arith.constant dense<0.000000e+00> : vector<16x256xf32>
    %8 = tpu.matmul %5, %7, %cst {dimension_numbers = #tpu.dot_dimension_numbers<[1], [0], [0], [1], [0, 0, 1, 1], [], []>} : vector<16x256xbf16>, vector<256x256xbf16>, vector<16x256xf32> -> vector<16x256xf32>
    %9 = arith.addf %4, %8 : vector<16x256xf32>
    %10 = vector.extract_strided_slice %1 {offsets = [1, 0], sizes = [16, 256], strides = [1, 1]} : vector<18x256xbf16> to vector<16x256xbf16>
    %c1 = arith.constant 1 : index
    %c0_7 = arith.constant 0 : index
    %c0_8 = arith.constant 0 : index
    %11 = vector.load %arg3[%c1, %c0_7, %c0_8] : memref<3x256x256xbf16, #tpu.memory_space<vmem>>, vector<1x256x256xbf16>
    %12 = vector.shape_cast %11 : vector<1x256x256xbf16> to vector<256x256xbf16>
    %cst_9 = arith.constant dense<0.000000e+00> : vector<16x256xf32>
    %13 = tpu.matmul %10, %12, %cst_9 {dimension_numbers = #tpu.dot_dimension_numbers<[1], [0], [0], [1], [0, 0, 1, 1], [], []>} : vector<16x256xbf16>, vector<256x256xbf16>, vector<16x256xf32> -> vector<16x256xf32>
    %14 = arith.addf %9, %13 : vector<16x256xf32>
    %15 = vector.extract_strided_slice %1 {offsets = [2, 0], sizes = [16, 256], strides = [1, 1]} : vector<18x256xbf16> to vector<16x256xbf16>
    %c2 = arith.constant 2 : index
    %c0_10 = arith.constant 0 : index
    %c0_11 = arith.constant 0 : index
    %16 = vector.load %arg3[%c2, %c0_10, %c0_11] : memref<3x256x256xbf16, #tpu.memory_space<vmem>>, vector<1x256x256xbf16>
    %17 = vector.shape_cast %16 : vector<1x256x256xbf16> to vector<256x256xbf16>
    %cst_12 = arith.constant dense<0.000000e+00> : vector<16x256xf32>
    %18 = tpu.matmul %15, %17, %cst_12 {dimension_numbers = #tpu.dot_dimension_numbers<[1], [0], [0], [1], [0, 0, 1, 1], [], []>} : vector<16x256xbf16>, vector<256x256xbf16>, vector<16x256xf32> -> vector<16x256xf32>
    %19 = arith.addf %14, %18 : vector<16x256xf32>
    %cst_13 = arith.constant 0.000000e+00 : f32
    %20 = vector.broadcast %cst_13 : f32 to vector<16x256xf32>
    %21 = arith.maximumf %19, %20 : vector<16x256xf32>
    %c1_14 = arith.constant 1 : index
    %c0_15 = arith.constant 0 : index
    %22 = vector.load %arg8[%c1_14, %c0_15] : memref<18x256xf32, #tpu.memory_space<vmem>>, vector<16x256xf32>
    tpu.vector_store %arg8[%c1_14, %c0_15], %21 {strides = array<i32>} : memref<18x256xf32, #tpu.memory_space<vmem>>, vector<16x256xf32>,
    %23 = vector.extract_strided_slice %21 {offsets = [1, 0], sizes = [1, 256], strides = [1, 1]} : vector<16x256xf32> to vector<1x256xf32>
    %c0_16 = arith.constant 0 : index
    %c0_17 = arith.constant 0 : index
    %24 = vector.load %arg8[%c0_16, %c0_17] : memref<18x256xf32, #tpu.memory_space<vmem>>, vector<1x256xf32>
    tpu.vector_store %arg8[%c0_16, %c0_17], %23 {strides = array<i32>} : memref<18x256xf32, #tpu.memory_space<vmem>>, vector<1x256xf32>,
    %25 = vector.extract_strided_slice %21 {offsets = [14, 0], sizes = [1, 256], strides = [1, 1]} : vector<16x256xf32> to vector<1x256xf32>
    %c17 = arith.constant 17 : index
    %c0_18 = arith.constant 0 : index
    %26 = vector.load %arg8[%c17, %c0_18] : memref<18x256xf32, #tpu.memory_space<vmem>>, vector<1x256xf32>
    tpu.vector_store %arg8[%c17, %c0_18], %25 {strides = array<i32>} : memref<18x256xf32, #tpu.memory_space<vmem>>, vector<1x256xf32>,
    %c0_19 = arith.constant 0 : index
    %c0_20 = arith.constant 0 : index
    %27 = vector.load %arg6[%c0_19, %c0_20] : memref<1x256xf32, #tpu.memory_space<vmem>>, vector<1x256xf32>
    %28 = vector.shape_cast %27 : vector<1x256xf32> to vector<1x256xf32>
    %29 = vector.broadcast %28 : vector<1x256xf32> to vector<16x256xf32>
    %c0_21 = arith.constant 0 : index
    %c0_22 = arith.constant 0 : index
    %30 = vector.load %arg8[%c0_21, %c0_22] : memref<18x256xf32, #tpu.memory_space<vmem>>, vector<16x256xf32>
    %31 = arith.truncf %30 : vector<16x256xf32> to vector<16x256xbf16>
    %c0_23 = arith.constant 0 : index
    %c0_24 = arith.constant 0 : index
    %c0_25 = arith.constant 0 : index
    %32 = vector.load %arg5[%c0_23, %c0_24, %c0_25] : memref<3x256x256xbf16, #tpu.memory_space<vmem>>, vector<1x256x256xbf16>
    %33 = vector.shape_cast %32 : vector<1x256x256xbf16> to vector<256x256xbf16>
    %cst_26 = arith.constant dense<0.000000e+00> : vector<16x256xf32>
    %34 = tpu.matmul %31, %33, %cst_26 {dimension_numbers = #tpu.dot_dimension_numbers<[1], [0], [0], [1], [0, 0, 1, 1], [], []>} : vector<16x256xbf16>, vector<256x256xbf16>, vector<16x256xf32> -> vector<16x256xf32>
    %35 = arith.addf %29, %34 : vector<16x256xf32>
    %c1_27 = arith.constant 1 : index
    %c0_28 = arith.constant 0 : index
    %36 = vector.load %arg8[%c1_27, %c0_28] : memref<18x256xf32, #tpu.memory_space<vmem>>, vector<16x256xf32>
    %37 = arith.truncf %36 : vector<16x256xf32> to vector<16x256xbf16>
    %c1_29 = arith.constant 1 : index
    %c0_30 = arith.constant 0 : index
    %c0_31 = arith.constant 0 : index
    %38 = vector.load %arg5[%c1_29, %c0_30, %c0_31] : memref<3x256x256xbf16, #tpu.memory_space<vmem>>, vector<1x256x256xbf16>
    %39 = vector.shape_cast %38 : vector<1x256x256xbf16> to vector<256x256xbf16>
    %cst_32 = arith.constant dense<0.000000e+00> : vector<16x256xf32>
    %40 = tpu.matmul %37, %39, %cst_32 {dimension_numbers = #tpu.dot_dimension_numbers<[1], [0], [0], [1], [0, 0, 1, 1], [], []>} : vector<16x256xbf16>, vector<256x256xbf16>, vector<16x256xf32> -> vector<16x256xf32>
    %41 = arith.addf %35, %40 : vector<16x256xf32>
    %c2_33 = arith.constant 2 : index
    %c0_34 = arith.constant 0 : index
    %42 = vector.load %arg8[%c2_33, %c0_34] : memref<18x256xf32, #tpu.memory_space<vmem>>, vector<16x256xf32>
    %43 = arith.truncf %42 : vector<16x256xf32> to vector<16x256xbf16>
    %c2_35 = arith.constant 2 : index
    %c0_36 = arith.constant 0 : index
    %c0_37 = arith.constant 0 : index
    %44 = vector.load %arg5[%c2_35, %c0_36, %c0_37] : memref<3x256x256xbf16, #tpu.memory_space<vmem>>, vector<1x256x256xbf16>
    %45 = vector.shape_cast %44 : vector<1x256x256xbf16> to vector<256x256xbf16>
    %cst_38 = arith.constant dense<0.000000e+00> : vector<16x256xf32>
    %46 = tpu.matmul %43, %45, %cst_38 {dimension_numbers = #tpu.dot_dimension_numbers<[1], [0], [0], [1], [0, 0, 1, 1], [], []>} : vector<16x256xbf16>, vector<256x256xbf16>, vector<16x256xf32> -> vector<16x256xf32>
    %47 = arith.addf %41, %46 : vector<16x256xf32>
    %c0_39 = arith.constant 0 : index
    %c0_40 = arith.constant 0 : index
    %c0_41 = arith.constant 0 : index
    %48 = vector.load %arg2[%c0_39, %c0_40, %c0_41] : memref<1x16x256xf32, #tpu.memory_space<vmem>>, vector<1x16x256xf32>
    %49 = vector.shape_cast %48 : vector<1x16x256xf32> to vector<16x256xf32>
    %50 = arith.addf %49, %47 : vector<16x256xf32>
    %c0_42 = arith.constant 0 : index
    %c0_43 = arith.constant 0 : index
    %c0_44 = arith.constant 0 : index
    %51 = vector.load %arg7[%c0_42, %c0_43, %c0_44] : memref<1x16x256xf32, #tpu.memory_space<vmem>>, vector<1x16x256xf32>
    %52 = vector.shape_cast %51 : vector<1x16x256xf32> to vector<16x256xf32>
    %53 = vector.shape_cast %50 : vector<16x256xf32> to vector<1x16x256xf32>
    tpu.vector_store %arg7[%c0_42, %c0_43, %c0_44], %53 {strides = array<i32>} : memref<1x16x256xf32, #tpu.memory_space<vmem>>, vector<1x16x256xf32>,
    return
  }
  func.func @transform_0(%arg0: i32) -> (i32, i32, i32) {
    %c0_i32 = arith.constant 0 : i32
    %c0_i32_0 = arith.constant 0 : i32
    %c0_i32_1 = arith.constant 0 : i32
    return %arg0, %c0_i32, %c0_i32_0 : i32, i32, i32
  }
  func.func @transform_1(%arg0: i32) -> (i32, i32, i32) {
    %c0_i32 = arith.constant 0 : i32
    %c0_i32_0 = arith.constant 0 : i32
    %c0_i32_1 = arith.constant 0 : i32
    return %arg0, %c0_i32, %c0_i32_0 : i32, i32, i32
  }
  func.func @transform_2(%arg0: i32) -> (i32, i32, i32) {
    %c0_i32 = arith.constant 0 : i32
    %c0_i32_0 = arith.constant 0 : i32
    %c0_i32_1 = arith.constant 0 : i32
    %c0_i32_2 = arith.constant 0 : i32
    return %c0_i32, %c0_i32_0, %c0_i32_1 : i32, i32, i32
  }
  func.func @transform_3(%arg0: i32) -> (i32, i32) {
    %c0_i32 = arith.constant 0 : i32
    %c0_i32_0 = arith.constant 0 : i32
    %c0_i32_1 = arith.constant 0 : i32
    return %c0_i32, %c0_i32_0 : i32, i32
  }
  func.func @transform_4(%arg0: i32) -> (i32, i32, i32) {
    %c0_i32 = arith.constant 0 : i32
    %c0_i32_0 = arith.constant 0 : i32
    %c0_i32_1 = arith.constant 0 : i32
    %c0_i32_2 = arith.constant 0 : i32
    return %c0_i32, %c0_i32_0, %c0_i32_1 : i32, i32, i32
  }
  func.func @transform_5(%arg0: i32) -> (i32, i32) {
    %c0_i32 = arith.constant 0 : i32
    %c0_i32_0 = arith.constant 0 : i32
    %c0_i32_1 = arith.constant 0 : i32
    return %c0_i32, %c0_i32_0 : i32, i32
  }
  func.func @transform_6(%arg0: i32) -> (i32, i32, i32) {
    %c0_i32 = arith.constant 0 : i32
    %c0_i32_0 = arith.constant 0 : i32
    %c0_i32_1 = arith.constant 0 : i32
    return %arg0, %c0_i32, %c0_i32_0 : i32, i32, i32
  }
}

</mosaic_0001>

<bundles_post_ra>
// kernel: resblock_pallas.1
= control target key start
LH: loop header
LB: loop body
LE: loop exit
PB: predicated region body
PF: predicated region fallthrough
CT: control target
= control target key end

     0   :  { %s3205_s21 = smov 0   ;;  %s4507_s0 = inlined_call_operand.vmem [shape: bf16[2,18,256], index: 0, kind: input, shape index: {}]   ;;  %s4508_s1 = inlined_call_operand.vmem [shape: f32[2,16,256], index: 1, kind: input, shape index: {}]   ;;  %s4509_s2 = inlined_call_operand.vmem [shape: bf16[3,256,256], index: 2, kind: input, shape index: {}]   ;;  %s4510_s3 = inlined_call_operand.vmem [shape: f32[1,256], index: 3, kind: input, shape index: {}]   ;;  %s4511_s4 = inlined_call_operand.vmem [shape: bf16[3,256,256], index: 4, kind: input, shape index: {}]   ;;  %s4512_s5 = inlined_call_operand.vmem [shape: f32[1,256], index: 5, kind: input, shape index: {}]   ;;  %s4513_s6 = inlined_call_operand.vmem [shape: f32[2,16,256], index: 6, kind: output, shape index: {}]  }
   0x1 LB: > { %s2041_s22 = sadd.s32 4294967295, %s3168_s21   ;;  %p2045_p0 = scmp.ge.s32.totalorder %s3168_s21, 1  ;;  %s3168_s21 = sphi %s3205_s21, %s16_s21  }
   0x2   : > { %p222_p1 = scmp.lt.s32.totalorder %s3168_s21, 3 }
   0x4   : > { %p223_p2 = pnand %p2045_p0, %p222_p1 }
   0x5   : > { %p257_p3 = scmp.lt.s32.totalorder (!%p223_p2), %s2041_s22, 1 }
   0x6   : > { %226 = sbr.rel (%p223_p2) target bundleno = 448 (0x1c0), region = 44 }
   0xb   : > { %v2117_v0 = vld [vmem:[%s4509_s2 + $0x70] sm:$0xf]  ;;  %v2976_v1 = vld [vmem:[%s4509_s2 + $0x74] sm:$0xf0]  ;;  %v2975_v5 = vld [vmem:[%s4509_s2 + $0x74] sm:$0xf] }
   0xc   : > { %v2181_v2 = vld [vmem:[%s4509_s2 + $0xf0] sm:$0xf]  ;;  %v2118_v3 = vor.u32 %v2976_v1, %v2117_v0  ;;  %v2992_v4 = vld [vmem:[%s4509_s2 + $0xf4] sm:$0xf0]  ;;  %v2119_v6 = vld [vmem:[%s4509_s2 + $0x78] sm:$0xf0] }
   0xd   : > { %v2182_v7 = vor.u32 %v2992_v4, %v2181_v2  ;;  %v2122_v8 = vor.u32 %v2975_v5, %v2119_v6  ;;  %v2991_v9 = vld [vmem:[%s4509_s2 + $0xf4] sm:$0xf]  ;;  %v2183_v10 = vld [vmem:[%s4509_s2 + $0xf8] sm:$0xf0]  ;;  %v2109_v11 = vld [vmem:[%s4509_s2 + $0x60] sm:$0xf] }
   0xe   : > { %483 = vmatpush.bf16.msra.mxu0 %v2118_v3  ;;  %v2186_v12 = vor.u32 %v2991_v9, %v2183_v10  ;;  %v2974_v13 = vld [vmem:[%s4509_s2 + $0x64] sm:$0xf0]  ;;  %v2173_v14 = vld [vmem:[%s4509_s2 + $0xe0] sm:$0xf]  ;;  %v2973_v18 = vld [vmem:[%s4509_s2 + $0x64] sm:$0xf] }
   0xf   : > { %v2990_v15 = vld [vmem:[%s4509_s2 + $0xe4] sm:$0xf0]  ;;  %497 = vmatpush.bf16.msra.mxu1 %v2182_v7  ;;  %511 = vmatpush.bf16.msra.mxu2 %v2122_v8  ;;  %v2110_v16 = vor.u32 %v2974_v13, %v2109_v11  ;;  %v2111_v19 = vld [vmem:[%s4509_s2 + $0x68] sm:$0xf0]  ;;  %v2989_v20 = vld [vmem:[%s4509_s2 + $0xe4] sm:$0xf] }
  0x10   : > { %v2174_v17 = vor.u32 %v2990_v15, %v2173_v14  ;;  %525 = vmatpush.bf16.msra.mxu3 %v2186_v12  ;;  %v2114_v21 = vor.u32 %v2973_v18, %v2111_v19  ;;  %v2175_v22 = vld [vmem:[%s4509_s2 + $0xe8] sm:$0xf0]  ;;  %v2101_v23 = vld [vmem:[%s4509_s2 + $0x50] sm:$0xf]  ;;  %v2972_v24 = vld [vmem:[%s4509_s2 + $0x54] sm:$0xf0] }
  0x11   : > { %v2178_v25 = vor.u32 %v2989_v20, %v2175_v22  ;;  %v2165_v26 = vld [vmem:[%s4509_s2 + $0xd0] sm:$0xf]  ;;  %v2988_v27 = vld [vmem:[%s4509_s2 + $0xd4] sm:$0xf0]  ;;  %v2971_v28 = vld [vmem:[%s4509_s2 + $0x54] sm:$0xf]  ;;  %v2102_v29 = vor.u32 %v2972_v24, %v2101_v23 }
  0x12   : > { %484 = vmatpush.bf16.msra.mxu0 %v2110_v16  ;;  %v2103_v30 = vld [vmem:[%s4509_s2 + $0x58] sm:$0xf0]  ;;  %v2987_v31 = vld [vmem:[%s4509_s2 + $0xd4] sm:$0xf]  ;;  %v2166_v33 = vor.u32 %v2988_v27, %v2165_v26  ;;  %v2093_v35 = vld [vmem:[%s4509_s2 + $0x40] sm:$0xf] }
  0x13   : > { %v2167_v32 = vld [vmem:[%s4509_s2 + $0xd8] sm:$0xf0]  ;;  %498 = vmatpush.bf16.msra.mxu1 %v2174_v17  ;;  %512 = vmatpush.bf16.msra.mxu2 %v2114_v21  ;;  %v2106_v34 = vor.u32 %v2971_v28, %v2103_v30  ;;  %v2970_v36 = vld [vmem:[%s4509_s2 + $0x44] sm:$0xf0]  ;;  %v2157_v37 = vld [vmem:[%s4509_s2 + $0xc0] sm:$0xf] }
  0x14   : > { %526 = vmatpush.bf16.msra.mxu3 %v2178_v25  ;;  %v2170_v38 = vor.u32 %v2987_v31, %v2167_v32  ;;  %v2986_v39 = vld [vmem:[%s4509_s2 + $0xc4] sm:$0xf0]  ;;  %v2969_v40 = vld [vmem:[%s4509_s2 + $0x44] sm:$0xf]  ;;  %v2095_v41 = vld [vmem:[%s4509_s2 + $0x48] sm:$0xf0]  ;;  %v2094_v44 = vor.u32 %v2970_v36, %v2093_v35 }
  0x15   : > { %v2985_v42 = vld [vmem:[%s4509_s2 + $0xc4] sm:$0xf]  ;;  %v2159_v43 = vld [vmem:[%s4509_s2 + $0xc8] sm:$0xf0]  ;;  %v2158_v45 = vor.u32 %v2986_v39, %v2157_v37  ;;  %v2098_v46 = vor.u32 %v2969_v40, %v2095_v41  ;;  %v2085_v47 = vld [vmem:[%s4509_s2 + $0x30] sm:$0xf] }
  0x16   : > { %485 = vmatpush.bf16.msra.mxu0 %v2102_v29  ;;  %v2968_v48 = vld [vmem:[%s4509_s2 + $0x34] sm:$0xf0]  ;;  %v2149_v49 = vld [vmem:[%s4509_s2 + $0xb0] sm:$0xf]  ;;  %v2162_v50 = vor.u32 %v2985_v42, %v2159_v43  ;;  %v2967_v52 = vld [vmem:[%s4509_s2 + $0x34] sm:$0xf] }
  0x17   : > { %499 = vmatpush.bf16.msra.mxu1 %v2166_v33  ;;  %513 = vmatpush.bf16.msra.mxu2 %v2106_v34  ;;  %v2984_v51 = vld [vmem:[%s4509_s2 + $0xb4] sm:$0xf0]  ;;  %v2087_v53 = vld [vmem:[%s4509_s2 + $0x38] sm:$0xf0]  ;;  %v2983_v54 = vld [vmem:[%s4509_s2 + $0xb4] sm:$0xf]  ;;  %v2086_v56 = vor.u32 %v2968_v48, %v2085_v47 }
  0x18   : > { %527 = vmatpush.bf16.msra.mxu3 %v2170_v38  ;;  %v2151_v55 = vld [vmem:[%s4509_s2 + $0xb8] sm:$0xf0]  ;;  %v2150_v57 = vor.u32 %v2984_v51, %v2149_v49  ;;  %v2090_v58 = vor.u32 %v2967_v52, %v2087_v53  ;;  %v2077_v59 = vld [vmem:[%s4509_s2 + $0x20] sm:$0xf]  ;;  %v2966_v60 = vld [vmem:[%s4509_s2 + $0x24] sm:$0xf0] }
  0x19   : > { %v2141_v61 = vld [vmem:[%s4509_s2 + $0xa0] sm:$0xf]  ;;  %v2154_v62 = vor.u32 %v2983_v54, %v2151_v55  ;;  %v2982_v63 = vld [vmem:[%s4509_s2 + $0xa4] sm:$0xf0]  ;;  %v2965_v0 = vld [vmem:[%s4509_s2 + $0x24] sm:$0xf]  ;;  %v2078_v4 = vor.u32 %v2966_v60, %v2077_v59 }
  0x1a   : > { %486 = vmatpush.bf16.msra.mxu0 %v2094_v44  ;;  %v2079_v1 = vld [vmem:[%s4509_s2 + $0x28] sm:$0xf0]  ;;  %v2981_v2 = vld [vmem:[%s4509_s2 + $0xa4] sm:$0xf]  ;;  %v2142_v5 = vor.u32 %v2982_v63, %v2141_v61  ;;  %v2069_v7 = vld [vmem:[%s4509_s2 + $0x10] sm:$0xf] }
  0x1b   : > { %500 = vmatpush.bf16.msra.mxu1 %v2158_v45  ;;  %514 = vmatpush.bf16.msra.mxu2 %v2098_v46  ;;  %v2143_v3 = vld [vmem:[%s4509_s2 + $0xa8] sm:$0xf0]  ;;  %v2082_v6 = vor.u32 %v2965_v0, %v2079_v1  ;;  %v2964_v8 = vld [vmem:[%s4509_s2 + $0x14] sm:$0xf0]  ;;  %v2133_v9 = vld [vmem:[%s4509_s2 + $0x90] sm:$0xf] }
  0x1c   : > { %528 = vmatpush.bf16.msra.mxu3 %v2162_v50  ;;  %v2146_v10 = vor.u32 %v2981_v2, %v2143_v3  ;;  %v2980_v11 = vld [vmem:[%s4509_s2 + $0x94] sm:$0xf0]  ;;  %v2963_v12 = vld [vmem:[%s4509_s2 + $0x14] sm:$0xf]  ;;  %v2071_v13 = vld [vmem:[%s4509_s2 + $0x18] sm:$0xf0]  ;;  %v2070_v16 = vor.u32 %v2964_v8, %v2069_v7 }
  0x1d   : > { %v2979_v14 = vld [vmem:[%s4509_s2 + $0x94] sm:$0xf]  ;;  %v2135_v15 = vld [vmem:[%s4509_s2 + $0x98] sm:$0xf0]  ;;  %v2061_v17 = vld [vmem:[%s4509_s2] sm:$0xf]  ;;  %v2134_v19 = vor.u32 %v2980_v11, %v2133_v9  ;;  %v2074_v20 = vor.u32 %v2963_v12, %v2071_v13 }
  0x1e   : > { %487 = vmatpush.bf16.msra.mxu0 %v2086_v56  ;;  %v2962_v18 = vld [vmem:[%s4509_s2 + $0x4] sm:$0xf0]  ;;  %v2125_v21 = vld [vmem:[%s4509_s2 + $0x80] sm:$0xf]  ;;  %v2961_v23 = vld [vmem:[%s4509_s2 + $0x4] sm:$0xf]  ;;  %v2138_v24 = vor.u32 %v2979_v14, %v2135_v15 }
  0x1f   : > { %501 = vmatpush.bf16.msra.mxu1 %v2150_v57  ;;  %515 = vmatpush.bf16.msra.mxu2 %v2090_v58  ;;  %v2978_v22 = vld [vmem:[%s4509_s2 + $0x84] sm:$0xf0]  ;;  %v2063_v25 = vld [vmem:[%s4509_s2 + $0x8] sm:$0xf0]  ;;  %v2977_v26 = vld [vmem:[%s4509_s2 + $0x84] sm:$0xf]  ;;  %v2062_v31 = vor.u32 %v2962_v18, %v2061_v17 }
  0x20   : > { %529 = vmatpush.bf16.msra.mxu3 %v2154_v62  ;;  %v2127_v27 = vld [vmem:[%s4509_s2 + $0x88] sm:$0xf0]  ;;  %v2277_v28 = vld [vmem:[%s4509_s2 + $0x170] sm:$0xf]  ;;  %v3008_v29 = vld [vmem:[%s4509_s2 + $0x174] sm:$0xf0]  ;;  %v2126_v35 = vor.u32 %v2978_v22, %v2125_v21  ;;  %v2066_v36 = vor.u32 %v2961_v23, %v2063_v25 }
  0x21   : > { %v2341_v30 = vld [vmem:[%s4509_s2 + $0x1f0] sm:$0xf]  ;;  %v3024_v32 = vld [vmem:[%s4509_s2 + $0x1f4] sm:$0xf0]  ;;  %v3007_v33 = vld [vmem:[%s4509_s2 + $0x174] sm:$0xf]  ;;  %v2130_v39 = vor.u32 %v2977_v26, %v2127_v27  ;;  %v2278_v40 = vor.u32 %v3008_v29, %v2277_v28 }
  0x22   : > { %488 = vmatpush.bf16.msra.mxu0 %v2078_v4  ;;  %v2279_v34 = vld [vmem:[%s4509_s2 + $0x178] sm:$0xf0]  ;;  %v3023_v37 = vld [vmem:[%s4509_s2 + $0x1f4] sm:$0xf]  ;;  %v2342_v41 = vor.u32 %v3024_v32, %v2341_v30  ;;  %v2269_v43 = vld [vmem:[%s4509_s2 + $0x160] sm:$0xf] }
  0x23   : > { %502 = vmatpush.bf16.msra.mxu1 %v2142_v5  ;;  %516 = vmatpush.bf16.msra.mxu2 %v2082_v6  ;;  %v2343_v38 = vld [vmem:[%s4509_s2 + $0x1f8] sm:$0xf0]  ;;  %v2282_v42 = vor.u32 %v3007_v33, %v2279_v34  ;;  %v3006_v44 = vld [vmem:[%s4509_s2 + $0x164] sm:$0xf0]  ;;  %v2333_v45 = vld [vmem:[%s4509_s2 + $0x1e0] sm:$0xf] }
  0x24   : > { %530 = vmatpush.bf16.msra.mxu3 %v2146_v10  ;;  %v2346_v46 = vor.u32 %v3023_v37, %v2343_v38  ;;  %v3022_v47 = vld [vmem:[%s4509_s2 + $0x1e4] sm:$0xf0]  ;;  %v3005_v48 = vld [vmem:[%s4509_s2 + $0x164] sm:$0xf]  ;;  %v2271_v49 = vld [vmem:[%s4509_s2 + $0x168] sm:$0xf0]  ;;  %v2270_v52 = vor.u32 %v3006_v44, %v2269_v43 }
  0x25   : > { %v3021_v50 = vld [vmem:[%s4509_s2 + $0x1e4] sm:$0xf]  ;;  %v2335_v51 = vld [vmem:[%s4509_s2 + $0x1e8] sm:$0xf0]  ;;  %v2261_v53 = vld [vmem:[%s4509_s2 + $0x150] sm:$0xf]  ;;  %v2334_v54 = vor.u32 %v3022_v47, %v2333_v45  ;;  %v2274_v55 = vor.u32 %v3005_v48, %v2271_v49 }
  0x26   : > { %489 = vmatpush.bf16.msra.mxu0 %v2070_v16  ;;  %v3004_v56 = vld [vmem:[%s4509_s2 + $0x154] sm:$0xf0]  ;;  %v2325_v57 = vld [vmem:[%s4509_s2 + $0x1d0] sm:$0xf]  ;;  %s4517_s22 = smov (!%p257_p3, %s2041_s22), 1  ;;  %v2338_v58 = vor.u32 %v3021_v50, %v2335_v51  ;;  %vm861_vm1 = vcmask 1046528  }
  0x27   : > { %503 = vmatpush.bf16.msra.mxu1 %v2134_v19  ;;  %517 = vmatpush.bf16.msra.mxu2 %v2074_v20  ;;  %v3020_v59 = vld [vmem:[%s4509_s2 + $0x1d4] sm:$0xf0]  ;;  %v3003_v60 = vld [vmem:[%s4509_s2 + $0x154] sm:$0xf]  ;;  %v2263_v61 = vld [vmem:[%s4509_s2 + $0x158] sm:$0xf0]  ;;  %v2262_v0 = vor.u32 %v3004_v56, %v2261_v53 }
  0x28   : > { %531 = vmatpush.bf16.msra.mxu3 %v2138_v24  ;;  %v3019_v62 = vld [vmem:[%s4509_s2 + $0x1d4] sm:$0xf]  ;;  %v2327_v63 = vld [vmem:[%s4509_s2 + $0x1d8] sm:$0xf0]  ;;  %s3153_s23 = smul.u32 24, %s4517_s22  ;;  %v2326_v4 = vor.u32 %v3020_v59, %v2325_v57  ;;  %v2266_v5 = vor.u32 %v3003_v60, %v2263_v61  ;;  %vm1098_vm2 = vcmask 1040384  }
  0x29   : > { %v2253_v1 = vld [vmem:[%s4509_s2 + $0x140] sm:$0xf]  ;;  %v3002_v2 = vld [vmem:[%s4509_s2 + $0x144] sm:$0xf0]  ;;  %v3001_v7 = vld [vmem:[%s4509_s2 + $0x144] sm:$0xf]  ;;  %v2330_v9 = vor.u32 %v3019_v62, %v2327_v63 }
  0x2a   : > { %490 = vmatpush.bf16.msra.mxu0 %v2062_v31  ;;  %v2317_v3 = vld [vmem:[%s4509_s2 + $0x1c0] sm:$0xf]  ;;  %v3018_v6 = vld [vmem:[%s4509_s2 + $0x1c4] sm:$0xf0]  ;;  %v2255_v8 = vld [vmem:[%s4509_s2 + $0x148] sm:$0xf0]  ;;  %s3505_s14 = scalar_lea.vmem %s4507_s0, %s3153_s23  ;;  %v2254_v17 = vor.u32 %v3002_v2, %v2253_v1 }
  0x2b   : > { %504 = vmatpush.bf16.msra.mxu1 %v2126_v35  ;;  %518 = vmatpush.bf16.msra.mxu2 %v2066_v36  ;;  %v2053_v10 = vld [vmem:[%s3505_s14] sm:$0xf]  ;;  %v2960_v11 = vld [vmem:[%s3505_s14 + $0x4] sm:$0xf0]  ;;  %v2959_v12 = vld [vmem:[%s3505_s14 + $0x4] sm:$0xf]  ;;  %v2318_v19 = vor.u32 %v3018_v6, %v2317_v3  ;;  %v2258_v20 = vor.u32 %v3001_v7, %v2255_v8 }
  0x2c   : > { %532 = vmatpush.bf16.msra.mxu3 %v2130_v39  ;;  %v3017_v13 = vld [vmem:[%s4509_s2 + $0x1c4] sm:$0xf]  ;;  %v2319_v14 = vld [vmem:[%s4509_s2 + $0x1c8] sm:$0xf0]  ;;  %v3516_v15 = vor.u32 %v2960_v11, %v2053_v10  ;;  %v2245_v21 = vld [vmem:[%s4509_s2 + $0x130] sm:$0xf] }
  0x2d   : > { %v2055_v16 = vld [vmem:[%s3505_s14 + $0x8] sm:$0xf0]  ;;  %v3000_v22 = vld [vmem:[%s4509_s2 + $0x134] sm:$0xf0]  ;;  %v2309_v23 = vld [vmem:[%s4509_s2 + $0x1b0] sm:$0xf]  ;;  %v2322_v24 = vor.u32 %v3017_v13, %v2319_v14 }
  0x2e   : > { %768 = vmatpush.bf16.msrb.mxu0 %v2278_v40  ;;  %v3519_v18 = vor.u32 %v2959_v12, %v2055_v16  ;;  %v3016_v25 = vld [vmem:[%s4509_s2 + $0x1b4] sm:$0xf0]  ;;  %v2999_v26 = vld [vmem:[%s4509_s2 + $0x134] sm:$0xf]  ;;  %v2247_v27 = vld [vmem:[%s4509_s2 + $0x138] sm:$0xf0]  ;;  %519 = vmatmul.bf16.vlgmr.msra.gmra.mxu2 %v3516_v15  ;;  %v2246_v30 = vor.u32 %v3000_v22, %v2245_v21 }
  0x2f   : > { %782 = vmatpush.bf16.msrb.mxu1 %v2342_v41  ;;  %796 = vmatpush.bf16.msrb.mxu2 %v2282_v42  ;;  %v3015_v28 = vld [vmem:[%s4509_s2 + $0x1b4] sm:$0xf]  ;;  %v2311_v29 = vld [vmem:[%s4509_s2 + $0x1b8] sm:$0xf0]  ;;  %v2237_v31 = vld [vmem:[%s4509_s2 + $0x120] sm:$0xf]  ;;  %v2310_v32 = vor.u32 %v3016_v25, %v2309_v23  ;;  %v2250_v33 = vor.u32 %v2999_v26, %v2247_v27 }
  0x30   : > { %810 = vmatpush.bf16.msrb.mxu3 %v2346_v46  ;;  %491 = vmatmul.bf16.vlgmr.msra.gmra.mxu0 %v3516_v15  ;;  %v2998_v34 = vld [vmem:[%s4509_s2 + $0x124] sm:$0xf0]  ;;  %v2301_v35 = vld [vmem:[%s4509_s2 + $0x1a0] sm:$0xf]  ;;  %v2314_v37 = vor.u32 %v3015_v28, %v2311_v29  ;;  %v2997_v38 = vld [vmem:[%s4509_s2 + $0x124] sm:$0xf] }
  0x31   : > { %505 = vmatmul.bf16.vlgmr.msra.gmra.mxu1 %v3519_v18  ;;  %533 = vmatmul.bf16.vlgmr.msra.gmra.mxu3 %v3519_v18  ;;  %v3014_v36 = vld [vmem:[%s4509_s2 + $0x1a4] sm:$0xf0]  ;;  %v2239_v39 = vld [vmem:[%s4509_s2 + $0x128] sm:$0xf0]  ;;  %v274_v40 = vld [vmem:[%s3505_s14 + $0x10] sm:$0x11]  ;;  %v2238_v45 = vor.u32 %v2998_v34, %v2237_v31 }
  0x32   : > { %769 = vmatpush.bf16.msrb.mxu0 %v2270_v52  ;;  %v3013_v41 = vld [vmem:[%s4509_s2 + $0x1a4] sm:$0xf]  ;;  %v2303_v42 = vld [vmem:[%s4509_s2 + $0x1a8] sm:$0xf0]  ;;  %v2229_v43 = vld [vmem:[%s4509_s2 + $0x110] sm:$0xf]  ;;  %v577_v44 = vunpack.c.l.b16 %v274_v40  ;;  %v578_v49 = vunpack.c.h.b16 %v274_v40  ;;  %v2302_v50 = vor.u32 %v3014_v36, %v2301_v35  ;;  %v2242_v51 = vor.u32 %v2997_v38, %v2239_v39 }
  0x33   : > { %783 = vmatpush.bf16.msrb.mxu1 %v2334_v54  ;;  %797 = vmatpush.bf16.msrb.mxu2 %v2274_v55  ;;  %v2996_v46 = vld [vmem:[%s4509_s2 + $0x114] sm:$0xf0]  ;;  %v2293_v47 = vld [vmem:[%s4509_s2 + $0x190] sm:$0xf]  ;;  %v2995_v52 = vld [vmem:[%s4509_s2 + $0x114] sm:$0xf]  ;;  %v2306_v56 = vor.u32 %v3013_v41, %v2303_v42 }
  0x34   : > { %811 = vmatpush.bf16.msrb.mxu3 %v2338_v58  ;;  %v3012_v48 = vld [vmem:[%s4509_s2 + $0x194] sm:$0xf0]  ;;  %v2231_v53 = vld [vmem:[%s4509_s2 + $0x118] sm:$0xf0]  ;;  %v3592_v54 = vpack.c.b16 %v577_v44, %v577_v44  ;;  %v585_v55 = vshll.u32 %v3516_v15, 16  ;;  %v3601_v59 = vpack.c.b16 %v578_v49, %v578_v49  ;;  %v597_v60 = vshll.u32 %v3519_v18, 16 }
  0x35   : > { %v3011_v57 = vld [vmem:[%s4509_s2 + $0x194] sm:$0xf]  ;;  %v2295_v58 = vld [vmem:[%s4509_s2 + $0x198] sm:$0xf0]  ;;  %v2221_v61 = vld [vmem:[%s4509_s2 + $0x100] sm:$0xf]  ;;  %v2294_v1 = vor.u32 %v3012_v48, %v2293_v47 }
  0x36   : > { %770 = vmatpush.bf16.msrb.mxu0 %v2262_v0  ;;  %v2994_v62 = vld [vmem:[%s4509_s2 + $0x104] sm:$0xf0]  ;;  %v2285_v63 = vld [vmem:[%s4509_s2 + $0x180] sm:$0xf]  ;;  %v2230_v0 = vor.u32 %v2996_v46, %v2229_v43  ;;  %v2993_v3 = vld [vmem:[%s4509_s2 + $0x104] sm:$0xf]  ;;  %v2298_v10 = vor.u32 %v3011_v57, %v2295_v58 }
  0x37   : > { %784 = vmatpush.bf16.msrb.mxu1 %v2326_v4  ;;  %798 = vmatpush.bf16.msrb.mxu2 %v2266_v5  ;;  %v3010_v2 = vld [vmem:[%s4509_s2 + $0x184] sm:$0xf0]  ;;  %v2223_v4 = vld [vmem:[%s4509_s2 + $0x108] sm:$0xf0]  ;;  %v2234_v5 = vor.u32 %v2995_v52, %v2231_v53  ;;  %v3009_v6 = vld [vmem:[%s4509_s2 + $0x184] sm:$0xf] }
  0x38   : > { %812 = vmatpush.bf16.msrb.mxu3 %v2330_v9  ;;  %v583_v7 = vshrl.u32 %v3516_v15, 16  ;;  %v587_v8 = vrot.slane %v585_v55, 1  ;;  %v590_v9 = vshll.u32 %v3592_v54, 16  ;;  %v2287_v11 = vld [vmem:[%s4509_s2 + $0x188] sm:$0xf0]  ;;  %v595_v12 = vshrl.u32 %v3519_v18, 16 }
  0x39   : > { %v599_v13 = vrot.slane %v597_v60, 1  ;;  %v602_v14 = vshll.u32 %v3601_v59, 16  ;;  %v2437_v16 = vld [vmem:[%s4509_s2 + $0x270] sm:$0xf]  ;;  %v2286_v21 = vor.u32 %v3010_v2, %v2285_v63  ;;  %v3056_v22 = vld [vmem:[%s4509_s2 + $0x2f4] sm:$0xf0]  ;;  %v2226_v25 = vor.u32 %v2993_v3, %v2223_v4 }
  0x3a   : > { %771 = vmatpush.bf16.msrb.mxu0 %v2254_v17  ;;  %v3040_v17 = vld [vmem:[%s4509_s2 + $0x274] sm:$0xf0]  ;;  %v3039_v23 = vld [vmem:[%s4509_s2 + $0x274] sm:$0xf]  ;;  %v2290_v26 = vor.u32 %v3009_v6, %v2287_v11  ;;  %v2503_v28 = vld [vmem:[%s4509_s2 + $0x2f8] sm:$0xf0]  ;;  %v588_v29 = vor.u32 %v587_v8, %v583_v7 }
  0x3b   : > { %785 = vmatpush.bf16.msrb.mxu1 %v2318_v19  ;;  %799 = vmatpush.bf16.msrb.mxu2 %v2258_v20  ;;  %v2501_v19 = vld [vmem:[%s4509_s2 + $0x2f0] sm:$0xf]  ;;  %v2222_v20 = vor.u32 %v2994_v62, %v2221_v61  ;;  %v3055_v27 = vld [vmem:[%s4509_s2 + $0x2f4] sm:$0xf]  ;;  %v2438_v31 = vor.u32 %v3040_v17, %v2437_v16  ;;  %vm581_vm0 = vsmask.f32 7424 }
  0x3c   : > { %813 = vmatpush.bf16.msrb.mxu3 %v2322_v24  ;;  %v2439_v24 = vld [vmem:[%s4509_s2 + $0x278] sm:$0xf0]  ;;  %v2502_v34 = vor.u32 %v3056_v22, %v2501_v19  ;;  %v2429_v36 = vld [vmem:[%s4509_s2 + $0x260] sm:$0xf]  ;;  %v2506_v39 = vor.u32 %v3055_v27, %v2503_v28  ;;  %v3054_v40 = vld [vmem:[%s4509_s2 + $0x2e4] sm:$0xf0] }
  0x3d   : > { %v2442_v35 = vor.u32 %v3039_v23, %v2439_v24  ;;  %v2493_v38 = vld [vmem:[%s4509_s2 + $0x2e0] sm:$0xf]  ;;  %v3037_v41 = vld [vmem:[%s4509_s2 + $0x264] sm:$0xf]  ;;  %v2431_v42 = vld [vmem:[%s4509_s2 + $0x268] sm:$0xf0] }
  0x3e   : > { %772 = vmatpush.bf16.msrb.mxu0 %v2246_v30  ;;  %v592_v30 = vrot.slane %v590_v9, 1  ;;  %v3053_v44 = vld [vmem:[%s4509_s2 + $0x2e4] sm:$0xf]  ;;  %v2494_v48 = vor.u32 %v3054_v40, %v2493_v38  ;;  %v2434_v49 = vor.u32 %v3037_v41, %v2431_v42  ;;  %v2485_v52 = vld [vmem:[%s4509_s2 + $0x2d0] sm:$0xf]  ;;  %s2957_s30 = sshll.u32 %s4517_s22, 5 }
  0x3f   : > { %786 = vmatpush.bf16.msrb.mxu1 %v2310_v32  ;;  %800 = vmatpush.bf16.msrb.mxu2 %v2250_v33  ;;  %v600_v32 = vor.u32 %v599_v13, %v595_v12  ;;  %v604_v33 = vrot.slane %v602_v14, 1  ;;  %v3052_v55 = vld [vmem:[%s4509_s2 + $0x2d4] sm:$0xf0]  ;;  %v2423_v57 = vld [vmem:[%s4509_s2 + $0x258] sm:$0xf0]  ;;  %s4489_s9 = scalar_lea.vmem %s4508_s1, %s2957_s30  ;;  %s4495_s11 = scalar_lea.vmem %s4513_s6, %s2957_s30 }
  0x40   : > { %814 = vmatpush.bf16.msrb.mxu3 %v2314_v37  ;;  %v3038_v37 = vld [vmem:[%s4509_s2 + $0x264] sm:$0xf0]  ;;  %v593_v43 = vsel %vm581_vm0, %v588_v29, %v592_v30  ;;  %v3051_v58 = vld [vmem:[%s4509_s2 + $0x2d4] sm:$0xf]  ;;  %v2487_v60 = vld [vmem:[%s4509_s2 + $0x2d8] sm:$0xf0]  ;;  %v2486_v62 = vor.u32 %v3052_v55, %v2485_v52 }
  0x41   : > { %v605_v46 = vsel %vm581_vm0, %v600_v32, %v604_v33  ;;  %v2430_v47 = vor.u32 %v3038_v37, %v2429_v36  ;;  %v2477_v2 = vld [vmem:[%s4509_s2 + $0x2c0] sm:$0xf]  ;;  %v2490_v3 = vor.u32 %v3051_v58, %v2487_v60  ;;  %v3050_v4 = vld [vmem:[%s4509_s2 + $0x2c4] sm:$0xf0]  ;;  %v2415_v6 = vld [vmem:[%s4509_s2 + $0x248] sm:$0xf0] }
  0x42   : > { %773 = vmatpush.bf16.msrb.mxu0 %v2238_v45  ;;  %v2495_v45 = vld [vmem:[%s4509_s2 + $0x2e8] sm:$0xf0]  ;;  %v3049_v7 = vld [vmem:[%s4509_s2 + $0x2c4] sm:$0xf]  ;;  %v2405_v12 = vld [vmem:[%s4509_s2 + $0x230] sm:$0xf] }
  0x43   : > { %787 = vmatpush.bf16.msrb.mxu1 %v2302_v50  ;;  %801 = vmatpush.bf16.msrb.mxu2 %v2242_v51  ;;  %v2421_v50 = vld [vmem:[%s4509_s2 + $0x250] sm:$0xf]  ;;  %v3036_v51 = vld [vmem:[%s4509_s2 + $0x254] sm:$0xf0]  ;;  %v2498_v53 = vor.u32 %v3053_v44, %v2495_v45  ;;  %v2479_v8 = vld [vmem:[%s4509_s2 + $0x2c8] sm:$0xf0] }
  0x44   : > { %815 = vmatpush.bf16.msrb.mxu3 %v2306_v56  ;;  %v3035_v56 = vld [vmem:[%s4509_s2 + $0x254] sm:$0xf]  ;;  %v2422_v61 = vor.u32 %v3036_v51, %v2421_v50  ;;  %v3032_v13 = vld [vmem:[%s4509_s2 + $0x234] sm:$0xf0]  ;;  %v2469_v14 = vld [vmem:[%s4509_s2 + $0x2b0] sm:$0xf]  ;;  %v2482_v16 = vor.u32 %v3049_v7, %v2479_v8 }
  0x45   : > { %v2426_v63 = vor.u32 %v3035_v56, %v2423_v57  ;;  %v3048_v17 = vld [vmem:[%s4509_s2 + $0x2b4] sm:$0xf0]  ;;  %v3031_v19 = vld [vmem:[%s4509_s2 + $0x234] sm:$0xf]  ;;  %v2471_v22 = vld [vmem:[%s4509_s2 + $0x2b8] sm:$0xf0]  ;;  %v2406_v23 = vor.u32 %v3032_v13, %v2405_v12 }
  0x46   : > { %774 = vmatpush.bf16.msrb.mxu0 %v2230_v0  ;;  %v2413_v0 = vld [vmem:[%s4509_s2 + $0x240] sm:$0xf]  ;;  %v2470_v24 = vor.u32 %v3048_v17, %v2469_v14  ;;  %v3030_v27 = vld [vmem:[%s4509_s2 + $0x224] sm:$0xf0]  ;;  %v2399_v32 = vld [vmem:[%s4509_s2 + $0x228] sm:$0xf0] }
  0x47   : > { %788 = vmatpush.bf16.msrb.mxu1 %v2294_v1  ;;  %802 = vmatpush.bf16.msrb.mxu2 %v2234_v5  ;;  %v3034_v1 = vld [vmem:[%s4509_s2 + $0x244] sm:$0xf0]  ;;  %v3033_v5 = vld [vmem:[%s4509_s2 + $0x244] sm:$0xf]  ;;  %v2461_v28 = vld [vmem:[%s4509_s2 + $0x2a0] sm:$0xf] }
  0x48   : > { %816 = vmatpush.bf16.msrb.mxu3 %v2298_v10  ;;  %v2414_v9 = vor.u32 %v3034_v1, %v2413_v0  ;;  %v2478_v10 = vor.u32 %v3050_v4, %v2477_v2  ;;  %v2418_v11 = vor.u32 %v3033_v5, %v2415_v6  ;;  %v3046_v30 = vld [vmem:[%s4509_s2 + $0x2a4] sm:$0xf0]  ;;  %v3045_v33 = vld [vmem:[%s4509_s2 + $0x2a4] sm:$0xf]  ;;  %v2389_v38 = vld [vmem:[%s4509_s2 + $0x210] sm:$0xf] }
  0x49   : > { %v2462_v36 = vor.u32 %v3046_v30, %v2461_v28  ;;  %v2453_v40 = vld [vmem:[%s4509_s2 + $0x290] sm:$0xf]  ;;  %v3044_v42 = vld [vmem:[%s4509_s2 + $0x294] sm:$0xf0]  ;;  %v2391_v44 = vld [vmem:[%s4509_s2 + $0x218] sm:$0xf0] }
  0x4a   : > { %775 = vmatpush.bf16.msrb.mxu0 %v2222_v20  ;;  %v2407_v20 = vld [vmem:[%s4509_s2 + $0x238] sm:$0xf0]  ;;  %v3043_v45 = vld [vmem:[%s4509_s2 + $0x294] sm:$0xf]  ;;  %v3026_v51 = vld [vmem:[%s4509_s2 + $0x204] sm:$0xf0] }
  0x4b   : > { %789 = vmatpush.bf16.msrb.mxu1 %v2286_v21  ;;  %803 = vmatpush.bf16.msrb.mxu2 %v2226_v25  ;;  %v3047_v21 = vld [vmem:[%s4509_s2 + $0x2b4] sm:$0xf]  ;;  %v2410_v25 = vor.u32 %v3031_v19, %v2407_v20  ;;  %v2445_v52 = vld [vmem:[%s4509_s2 + $0x280] sm:$0xf]  ;;  %v3025_v56 = vld [vmem:[%s4509_s2 + $0x204] sm:$0xf] }
  0x4c   : > { %817 = vmatpush.bf16.msrb.mxu3 %v2290_v26  ;;  %v2397_v26 = vld [vmem:[%s4509_s2 + $0x220] sm:$0xf]  ;;  %v2474_v29 = vor.u32 %v3047_v21, %v2471_v22  ;;  %v2383_v57 = vld [vmem:[%s4509_s2 + $0x208] sm:$0xf0]  ;;  %v3041_v58 = vld [vmem:[%s4509_s2 + $0x284] sm:$0xf] }
  0x4d   : > { %776 = vmatmul.bf16.vlgmr.msrb.gmra.mxu0 %v593_v43  ;;  %v2447_v60 = vld [vmem:[%s4509_s2 + $0x288] sm:$0xf0]  ;;  %v863_v0 = vrot.slane %v3592_v54, 1  ;;  %v2386_v1 = vor.u32 %v3025_v56, %v2383_v57  ;;  %v865_v2 = vrot.slane %v3519_v18, 1  ;;  %v3072_v18 = vld [vmem:[%s4511_s4 + $0x74] sm:$0xf0] }
  0x4e   : > { %1030 = vmatpush.bf16.msra.mxu0 %v2438_v31  ;;  %790 = vmatmul.bf16.vlgmr.msrb.gmra.mxu1 %v605_v46  ;;  %v3029_v31 = vld [vmem:[%s4509_s2 + $0x224] sm:$0xf]  ;;  %v2450_v4 = vor.u32 %v3041_v58, %v2447_v60  ;;  %v3071_v54 = vld [vmem:[%s4511_s4 + $0x74] sm:$0xf]  ;;  %v2567_v7 = vld [vmem:[%s4511_s4 + $0x78] sm:$0xf0] }
  0x4f   : > { %1044 = vmatpush.bf16.msra.mxu1 %v2502_v34  ;;  %1058 = vmatpush.bf16.msra.mxu2 %v2442_v35  ;;  %v2463_v34 = vld [vmem:[%s4509_s2 + $0x2a8] sm:$0xf0]  ;;  %v2398_v35 = vor.u32 %v3030_v27, %v2397_v26  ;;  %v2402_v37 = vor.u32 %v3029_v31, %v2399_v32  ;;  %v2629_v8 = vld [vmem:[%s4511_s4 + $0xf0] sm:$0xf]  ;;  %v3087_v12 = vld [vmem:[%s4511_s4 + $0xf4] sm:$0xf] }
  0x50   : > { %1072 = vmatpush.bf16.msra.mxu3 %v2506_v39  ;;  %804 = vmatmul.bf16.vlgmr.msrb.gmra.mxu2 %v593_v43  ;;  %v3028_v39 = vld [vmem:[%s4509_s2 + $0x214] sm:$0xf0]  ;;  %v2466_v41 = vor.u32 %v3045_v33, %v2463_v34  ;;  %v3027_v43 = vld [vmem:[%s4509_s2 + $0x214] sm:$0xf]  ;;  %v2631_v13 = vld [vmem:[%s4511_s4 + $0xf8] sm:$0xf0] }
  0x51   : > { %818 = vmatmul.bf16.vlgmr.msrb.gmra.mxu3 %v605_v46  ;;  %v2455_v46 = vld [vmem:[%s4509_s2 + $0x298] sm:$0xf0]  ;;  %v2394_v50 = vor.u32 %v3027_v43, %v2391_v44  ;;  %v2634_v14 = vor.u32 %v3087_v12, %v2631_v13  ;;  %v3070_v17 = vld [vmem:[%s4511_s4 + $0x64] sm:$0xf0]  ;;  %v3069_v19 = vld [vmem:[%s4511_s4 + $0x64] sm:$0xf] }
  0x52   : > { %1031 = vmatpush.bf16.msra.mxu0 %v2430_v47  ;;  %v2390_v47 = vor.u32 %v3028_v39, %v2389_v38  ;;  %v2458_v55 = vor.u32 %v3043_v45, %v2455_v46  ;;  %v2559_v21 = vld [vmem:[%s4511_s4 + $0x68] sm:$0xf0]  ;;  %v2621_v22 = vld [vmem:[%s4511_s4 + $0xe0] sm:$0xf]  ;;  %v3085_v26 = vld [vmem:[%s4511_s4 + $0xe4] sm:$0xf] }
  0x53   : > { %1045 = vmatpush.bf16.msra.mxu1 %v2494_v48  ;;  %1059 = vmatpush.bf16.msra.mxu2 %v2434_v49  ;;  %v2381_v48 = vld [vmem:[%s4509_s2 + $0x200] sm:$0xf]  ;;  %v2454_v49 = vor.u32 %v3044_v42, %v2453_v40  ;;  %v2623_v27 = vld [vmem:[%s4511_s4 + $0xe8] sm:$0xf0]  ;;  %v3068_v30 = vld [vmem:[%s4511_s4 + $0x54] sm:$0xf0] }
  0x54   : > { %1073 = vmatpush.bf16.msra.mxu3 %v2498_v53  ;;  %v3042_v53 = vld [vmem:[%s4509_s2 + $0x284] sm:$0xf0]  ;;  %v2626_v28 = vor.u32 %v3085_v26, %v2623_v27  ;;  %v3067_v31 = vld [vmem:[%s4511_s4 + $0x54] sm:$0xf]  ;;  %v2551_v33 = vld [vmem:[%s4511_s4 + $0x58] sm:$0xf0] }
  0x55   : > { %v2613_v34 = vld [vmem:[%s4511_s4 + $0xd0] sm:$0xf]  ;;  %v3083_v38 = vld [vmem:[%s4511_s4 + $0xd4] sm:$0xf]  ;;  %v2615_v39 = vld [vmem:[%s4511_s4 + $0xd8] sm:$0xf0] }
  0x56   : > { %1032 = vmatpush.bf16.msra.mxu0 %v2422_v61  ;;  %v2382_v61 = vor.u32 %v3026_v51, %v2381_v48  ;;  %v2618_v40 = vor.u32 %v3083_v38, %v2615_v39  ;;  %v3066_v42 = vld [vmem:[%s4511_s4 + $0x44] sm:$0xf0]  ;;  %v3065_v43 = vld [vmem:[%s4511_s4 + $0x44] sm:$0xf]  ;;  %v2543_v45 = vld [vmem:[%s4511_s4 + $0x48] sm:$0xf0] }
  0x57   : > { %1046 = vmatpush.bf16.msra.mxu1 %v2486_v62  ;;  %1060 = vmatpush.bf16.msra.mxu2 %v2426_v63  ;;  %v2446_v62 = vor.u32 %v3042_v53, %v2445_v52  ;;  %v862_v63 = vrot.slane %v3516_v15, 1  ;;  %v2565_v15 = vld [vmem:[%s4511_s4 + $0x70] sm:$0xf]  ;;  %v2605_v46 = vld [vmem:[%s4511_s4 + $0xc0] sm:$0xf]  ;;  %v2546_v48 = vor.u32 %v3065_v43, %v2543_v45 }
  0x58   : > { %1074 = vmatpush.bf16.msra.mxu3 %v2490_v3  ;;  %v866_v3 = vrot.slane %v3601_v59, 1  ;;  %v2566_v59 = vor.u32 %v3072_v18, %v2565_v15  ;;  %v2607_v51 = vld [vmem:[%s4511_s4 + $0xc8] sm:$0xf0]  ;;  %v2533_v53 = vld [vmem:[%s4511_s4 + $0x30] sm:$0xf] }
  0x59   : > { %v864_v5 = vsel %vm861_vm1, %v862_v63, %v863_v0  ;;  %v3063_v56 = vld [vmem:[%s4511_s4 + $0x34] sm:$0xf]  ;;  %v2535_v58 = vld [vmem:[%s4511_s4 + $0x38] sm:$0xf0]  ;;  %v2597_v60 = vld [vmem:[%s4511_s4 + $0xb0] sm:$0xf] }
  0x5a   : > { %1033 = vmatpush.bf16.msra.mxu0 %v2414_v9  ;;  %v867_v6 = vsel %vm861_vm1, %v865_v2, %v866_v3  ;;  %v3088_v9 = vld [vmem:[%s4511_s4 + $0xf4] sm:$0xf0]  ;;  %v3079_v0 = vld [vmem:[%s4511_s4 + $0xb4] sm:$0xf]  ;;  %v2525_v2 = vld [vmem:[%s4511_s4 + $0x20] sm:$0xf] }
  0x5b   : > { %1047 = vmatpush.bf16.msra.mxu1 %v2478_v10  ;;  %1061 = vmatpush.bf16.msra.mxu2 %v2418_v11  ;;  %v2570_v10 = vor.u32 %v3071_v54, %v2567_v7  ;;  %v2630_v11 = vor.u32 %v3088_v9, %v2629_v8  ;;  %v2589_v54 = vld [vmem:[%s4511_s4 + $0xa0] sm:$0xf]  ;;  %v3077_v7 = vld [vmem:[%s4511_s4 + $0xa4] sm:$0xf]  ;;  %v3060_v12 = vld [vmem:[%s4511_s4 + $0x14] sm:$0xf0] }
  0x5c   : > { %1075 = vmatpush.bf16.msra.mxu3 %v2482_v16  ;;  %v2557_v16 = vld [vmem:[%s4511_s4 + $0x60] sm:$0xf]  ;;  %v3103_v38 = vld [vmem:[%s4511_s4 + $0x174] sm:$0xf]  ;;  %v2727_v39 = vld [vmem:[%s4511_s4 + $0x178] sm:$0xf0] }
  0x5d   : > { %v2558_v20 = vor.u32 %v3070_v17, %v2557_v16  ;;  %v3059_v16 = vld [vmem:[%s4511_s4 + $0x14] sm:$0xf]  ;;  %v2519_v17 = vld [vmem:[%s4511_s4 + $0x18] sm:$0xf0]  ;;  %v3074_v43 = vld [vmem:[%s4511_s4 + $0x84] sm:$0xf0] }
  0x5e   : > { %1034 = vmatpush.bf16.msra.mxu0 %v2406_v23  ;;  %v3086_v23 = vld [vmem:[%s4511_s4 + $0xe4] sm:$0xf0]  ;;  %v2575_v45 = vld [vmem:[%s4511_s4 + $0x88] sm:$0xf0] }
  0x5f   : > { %1048 = vmatpush.bf16.msra.mxu1 %v2470_v24  ;;  %1062 = vmatpush.bf16.msra.mxu2 %v2410_v25  ;;  %v2562_v24 = vor.u32 %v3069_v19, %v2559_v21  ;;  %v2622_v25 = vor.u32 %v3086_v23, %v2621_v22  ;;  %v2581_v21 = vld [vmem:[%s4511_s4 + $0x90] sm:$0xf]  ;;  %v3076_v22 = vld [vmem:[%s4511_s4 + $0x94] sm:$0xf0]  ;;  %v3075_v23 = vld [vmem:[%s4511_s4 + $0x94] sm:$0xf] }
  0x60   : > { %1076 = vmatpush.bf16.msra.mxu3 %v2474_v29  ;;  %v2549_v29 = vld [vmem:[%s4511_s4 + $0x50] sm:$0xf] }
  0x61   : > { %v2550_v32 = vor.u32 %v3068_v30, %v2549_v29  ;;  %v3058_v29 = vld [vmem:[%s4511_s4 + $0x4] sm:$0xf0]  ;;  %v3057_v30 = vld [vmem:[%s4511_s4 + $0x4] sm:$0xf] }
  0x62   : > { %1035 = vmatpush.bf16.msra.mxu0 %v2398_v35  ;;  %v3084_v35 = vld [vmem:[%s4511_s4 + $0xd4] sm:$0xf0] }
  0x63   : > { %1049 = vmatpush.bf16.msra.mxu1 %v2462_v36  ;;  %1063 = vmatpush.bf16.msra.mxu2 %v2402_v37  ;;  %v2554_v36 = vor.u32 %v3067_v31, %v2551_v33  ;;  %v2614_v37 = vor.u32 %v3084_v35, %v2613_v34  ;;  %v2511_v33 = vld [vmem:[%s4511_s4 + $0x8] sm:$0xf0]  ;;  %v2725_v34 = vld [vmem:[%s4511_s4 + $0x170] sm:$0xf]  ;;  %v3104_v35 = vld [vmem:[%s4511_s4 + $0x174] sm:$0xf0] }
  0x64   : > { %1077 = vmatpush.bf16.msra.mxu3 %v2466_v41  ;;  %v2541_v41 = vld [vmem:[%s4511_s4 + $0x40] sm:$0xf] }
  0x65   : > { %v2542_v44 = vor.u32 %v3066_v42, %v2541_v41  ;;  %v2730_v42 = vor.u32 %v3103_v38, %v2727_v39  ;;  %v2693_v38 = vld [vmem:[%s4511_s4 + $0x130] sm:$0xf]  ;;  %v3096_v39 = vld [vmem:[%s4511_s4 + $0x134] sm:$0xf0] }
  0x66   : > { %1036 = vmatpush.bf16.msra.mxu0 %v2390_v47  ;;  %v3082_v47 = vld [vmem:[%s4511_s4 + $0xc4] sm:$0xf0] }
  0x67   : > { %1050 = vmatpush.bf16.msra.mxu1 %v2454_v49  ;;  %1064 = vmatpush.bf16.msra.mxu2 %v2394_v50  ;;  %v2606_v49 = vor.u32 %v3082_v47, %v2605_v46  ;;  %v3081_v50 = vld [vmem:[%s4511_s4 + $0xc4] sm:$0xf] }
  0x68   : > { %1078 = vmatpush.bf16.msra.mxu3 %v2458_v55  ;;  %v2610_v52 = vor.u32 %v3081_v50, %v2607_v51  ;;  %v3064_v55 = vld [vmem:[%s4511_s4 + $0x34] sm:$0xf0]  ;;  %v3119_v51 = vld [vmem:[%s4511_s4 + $0x1f4] sm:$0xf] }
  0x69   : > { %v2534_v57 = vor.u32 %v3064_v55, %v2533_v53  ;;  %v3120_v50 = vld [vmem:[%s4511_s4 + $0x1f4] sm:$0xf0]  ;;  %v2791_v53 = vld [vmem:[%s4511_s4 + $0x1f8] sm:$0xf0]  ;;  %v2717_v55 = vld [vmem:[%s4511_s4 + $0x160] sm:$0xf] }
  0x6a   : > { %1037 = vmatpush.bf16.msra.mxu0 %v2382_v61  ;;  %v3080_v61 = vld [vmem:[%s4511_s4 + $0xb4] sm:$0xf0] }
  0x6b   : > { %1051 = vmatpush.bf16.msra.mxu1 %v2446_v62  ;;  %1065 = vmatpush.bf16.msra.mxu2 %v2386_v1  ;;  %v2538_v62 = vor.u32 %v3063_v56, %v2535_v58  ;;  %v2598_v63 = vor.u32 %v3080_v61, %v2597_v60  ;;  %v2599_v1 = vld [vmem:[%s4511_s4 + $0xb8] sm:$0xf0]  ;;  %v3102_v56 = vld [vmem:[%s4511_s4 + $0x164] sm:$0xf0]  ;;  %v3101_v60 = vld [vmem:[%s4511_s4 + $0x164] sm:$0xf] }
  0x6c   : > { %1079 = vmatpush.bf16.msra.mxu3 %v2450_v4  ;;  %v2602_v3 = vor.u32 %v3079_v0, %v2599_v1  ;;  %v3062_v4 = vld [vmem:[%s4511_s4 + $0x24] sm:$0xf0]  ;;  %v2718_v58 = vor.u32 %v3102_v56, %v2717_v55  ;;  %v2719_v61 = vld [vmem:[%s4511_s4 + $0x168] sm:$0xf0]  ;;  %v3117_v1 = vld [vmem:[%s4511_s4 + $0x1e4] sm:$0xf] }
  0x6d   : > { %1038 = vmatmul.bf16.vlgmr.msra.gmra.mxu0 %v864_v5  ;;  %v2526_v15 = vor.u32 %v3062_v4, %v2525_v2  ;;  %v3118_v0 = vld [vmem:[%s4511_s4 + $0x1e4] sm:$0xf0]  ;;  %v2783_v2 = vld [vmem:[%s4511_s4 + $0x1e8] sm:$0xf0] }
  0x6e   : > { %1052 = vmatmul.bf16.vlgmr.msra.gmra.mxu1 %v867_v6  ;;  %1066 = vmatmul.bf16.vlgmr.msra.gmra.mxu2 %v864_v5  ;;  %v3061_v5 = vld [vmem:[%s4511_s4 + $0x24] sm:$0xf]  ;;  %v2786_v4 = vor.u32 %v3117_v1, %v2783_v2  ;;  %v2751_v2 = vld [vmem:[%s4511_s4 + $0x1a8] sm:$0xf0] }
  0x6f   : > { %1080 = vmatmul.bf16.vlgmr.msra.gmra.mxu3 %v867_v6  ;;  %1340 = vmatpush.bf16.msrb.mxu0 %v2566_v59  ;;  %v2527_v6 = vld [vmem:[%s4511_s4 + $0x28] sm:$0xf0]  ;;  %v3078_v59 = vld [vmem:[%s4511_s4 + $0xa4] sm:$0xf0]  ;;  %v3109_v1 = vld [vmem:[%s4511_s4 + $0x1a4] sm:$0xf] }
  0x70   : > { %1368 = vmatpush.bf16.msrb.mxu2 %v2570_v10  ;;  %1354 = vmatpush.bf16.msrb.mxu1 %v2630_v11  ;;  %v2530_v18 = vor.u32 %v3061_v5, %v2527_v6  ;;  %v2590_v9 = vor.u32 %v3078_v59, %v2589_v54  ;;  %v2591_v10 = vld [vmem:[%s4511_s4 + $0xa8] sm:$0xf0]  ;;  %v2517_v11 = vld [vmem:[%s4511_s4 + $0x10] sm:$0xf] }
  0x71   : > { %1382 = vmatpush.bf16.msrb.mxu3 %v2634_v14  ;;  %v2594_v14 = vor.u32 %v3077_v7, %v2591_v10  ;;  %v2518_v19 = vor.u32 %v3060_v12, %v2517_v11  ;;  %v2709_v6 = vld [vmem:[%s4511_s4 + $0x150] sm:$0xf]  ;;  %v2711_v7 = vld [vmem:[%s4511_s4 + $0x158] sm:$0xf0]  ;;  %v3116_v12 = vld [vmem:[%s4511_s4 + $0x1d4] sm:$0xf0] }
  0x72   : > { %v2773_v11 = vld [vmem:[%s4511_s4 + $0x1d0] sm:$0xf] }
  0x73   : > { %1341 = vmatpush.bf16.msrb.mxu0 %v2558_v20  ;;  %v2522_v20 = vor.u32 %v3059_v16, %v2519_v17  ;;  %v2774_v17 = vor.u32 %v3116_v12, %v2773_v11  ;;  %v2741_v11 = vld [vmem:[%s4511_s4 + $0x190] sm:$0xf]  ;;  %v3108_v12 = vld [vmem:[%s4511_s4 + $0x194] sm:$0xf0] }
  0x74   : > { %1369 = vmatpush.bf16.msrb.mxu2 %v2562_v24  ;;  %1355 = vmatpush.bf16.msrb.mxu1 %v2622_v25  ;;  %v2582_v24 = vor.u32 %v3076_v22, %v2581_v21  ;;  %v2583_v25 = vld [vmem:[%s4511_s4 + $0x98] sm:$0xf0]  ;;  %v2701_v21 = vld [vmem:[%s4511_s4 + $0x140] sm:$0xf]  ;;  %v3098_v22 = vld [vmem:[%s4511_s4 + $0x144] sm:$0xf0] }
  0x75   : > { %1383 = vmatpush.bf16.msrb.mxu3 %v2626_v28  ;;  %v2586_v26 = vor.u32 %v3075_v23, %v2583_v25  ;;  %v2509_v28 = vld [vmem:[%s4511_s4] sm:$0xf]  ;;  %v3097_v23 = vld [vmem:[%s4511_s4 + $0x144] sm:$0xf]  ;;  %v2703_v25 = vld [vmem:[%s4511_s4 + $0x148] sm:$0xf0] }
  0x77   : > { %1342 = vmatpush.bf16.msrb.mxu0 %v2550_v32  ;;  %v2510_v32 = vor.u32 %v3058_v29, %v2509_v28  ;;  %v3114_v28 = vld [vmem:[%s4511_s4 + $0x1c4] sm:$0xf0]  ;;  %v2706_v29 = vor.u32 %v3097_v23, %v2703_v25 }
  0x78   : > { %1370 = vmatpush.bf16.msrb.mxu2 %v2554_v36  ;;  %1356 = vmatpush.bf16.msrb.mxu1 %v2614_v37  ;;  %v2514_v36 = vor.u32 %v3057_v30, %v2511_v33  ;;  %v2726_v37 = vor.u32 %v3104_v35, %v2725_v34  ;;  %v2767_v33 = vld [vmem:[%s4511_s4 + $0x1c8] sm:$0xf0] }
  0x79   : > { %1384 = vmatpush.bf16.msrb.mxu3 %v2618_v40  ;;  %v2573_v40 = vld [vmem:[%s4511_s4 + $0x80] sm:$0xf] }
  0x7a   : > { %v2574_v47 = vor.u32 %v3074_v43, %v2573_v40  ;;  %v2694_v40 = vor.u32 %v3096_v39, %v2693_v38  ;;  %v2695_v43 = vld [vmem:[%s4511_s4 + $0x138] sm:$0xf0]  ;;  %v2733_v39 = vld [vmem:[%s4511_s4 + $0x180] sm:$0xf] }
  0x7b   : > { %1343 = vmatpush.bf16.msrb.mxu0 %v2542_v44  ;;  %v3073_v44 = vld [vmem:[%s4511_s4 + $0x84] sm:$0xf] }
  0x7c   : > { %1371 = vmatpush.bf16.msrb.mxu2 %v2546_v48  ;;  %1357 = vmatpush.bf16.msrb.mxu1 %v2606_v49  ;;  %v2578_v48 = vor.u32 %v3073_v44, %v2575_v45  ;;  %v2789_v49 = vld [vmem:[%s4511_s4 + $0x1f0] sm:$0xf] }
  0x7d   : > { %1385 = vmatpush.bf16.msrb.mxu3 %v2610_v52  ;;  %v2790_v52 = vor.u32 %v3120_v50, %v2789_v49  ;;  %v2757_v44 = vld [vmem:[%s4511_s4 + $0x1b0] sm:$0xf]  ;;  %v3111_v49 = vld [vmem:[%s4511_s4 + $0x1b4] sm:$0xf]  ;;  %v2759_v50 = vld [vmem:[%s4511_s4 + $0x1b8] sm:$0xf0] }
  0x7e   : > { %v2762_v55 = vor.u32 %v3111_v49, %v2759_v50 }
  0x7f   : > { %1344 = vmatpush.bf16.msrb.mxu0 %v2534_v57  ;;  %v2794_v57 = vor.u32 %v3119_v51, %v2791_v53 }
  0x80   : > { %1372 = vmatpush.bf16.msrb.mxu2 %v2538_v62  ;;  %1358 = vmatpush.bf16.msrb.mxu1 %v2598_v63  ;;  %v2781_v62 = vld [vmem:[%s4511_s4 + $0x1e0] sm:$0xf]  ;;  %v2722_v63 = vor.u32 %v3101_v60, %v2719_v61  ;;  %v3093_v60 = vld [vmem:[%s4511_s4 + $0x124] sm:$0xf] }
  0x81   : > { %1386 = vmatpush.bf16.msrb.mxu3 %v2602_v3  ;;  %v2782_v3 = vor.u32 %v3118_v0, %v2781_v62  ;;  %v3110_v62 = vld [vmem:[%s4511_s4 + $0x1a4] sm:$0xf0] }
  0x83   : > { %1345 = vmatpush.bf16.msrb.mxu0 %v2526_v15  ;;  %v3100_v15 = vld [vmem:[%s4511_s4 + $0x154] sm:$0xf0] }
  0x84   : > { %1373 = vmatpush.bf16.msrb.mxu2 %v2530_v18  ;;  %1359 = vmatpush.bf16.msrb.mxu1 %v2590_v9  ;;  %v3099_v18 = vld [vmem:[%s4511_s4 + $0x154] sm:$0xf]  ;;  %v2710_v59 = vor.u32 %v3100_v15, %v2709_v6  ;;  %v2677_v15 = vld [vmem:[%s4511_s4 + $0x110] sm:$0xf] }
  0x85   : > { %1387 = vmatpush.bf16.msrb.mxu3 %v2594_v14  ;;  %v2714_v9 = vor.u32 %v3099_v18, %v2711_v7  ;;  %v3115_v14 = vld [vmem:[%s4511_s4 + $0x1d4] sm:$0xf]  ;;  %v3092_v18 = vld [vmem:[%s4511_s4 + $0x114] sm:$0xf0] }
  0x87   : > { %1346 = vmatpush.bf16.msrb.mxu0 %v2518_v19  ;;  %v2775_v19 = vld [vmem:[%s4511_s4 + $0x1d8] sm:$0xf0] }
  0x88   : > { %1374 = vmatpush.bf16.msrb.mxu2 %v2522_v20  ;;  %1360 = vmatpush.bf16.msrb.mxu1 %v2582_v24  ;;  %v2778_v20 = vor.u32 %v3115_v14, %v2775_v19  ;;  %v2702_v24 = vor.u32 %v3098_v22, %v2701_v21  ;;  %v2742_v19 = vor.u32 %v3108_v12, %v2741_v11  ;;  %v2743_v21 = vld [vmem:[%s4511_s4 + $0x198] sm:$0xf0]  ;;  %v3136_v11 = vld [vmem:[%s4511_s4 + $0x274] sm:$0xf0]  ;;  %v3135_v12 = vld [vmem:[%s4511_s4 + $0x274] sm:$0xf] }
  0x89   : > { %1388 = vmatpush.bf16.msrb.mxu3 %v2586_v26  ;;  %v2765_v26 = vld [vmem:[%s4511_s4 + $0x1c0] sm:$0xf] }
  0x8a   : > { %v2766_v30 = vor.u32 %v3114_v28, %v2765_v26 }
  0x8b   : > { %1347 = vmatpush.bf16.msrb.mxu0 %v2510_v32  ;;  %v3113_v32 = vld [vmem:[%s4511_s4 + $0x1c4] sm:$0xf] }
  0x8c   : > { %1375 = vmatpush.bf16.msrb.mxu2 %v2514_v36  ;;  %1361 = vmatpush.bf16.msrb.mxu1 %v2574_v47  ;;  %v2770_v35 = vor.u32 %v3113_v32, %v2767_v33  ;;  %v4143_v36 = vld [vmem:[%s4510_s3] sm:$0x3]  ;;  %v3089_v32 = vld [vmem:[%s4511_s4 + $0x104] sm:$0xf] }
  0x8d   : > { %1389 = vmatpush.bf16.msrb.mxu3 %v2578_v48  ;;  %v3112_v48 = vld [vmem:[%s4511_s4 + $0x1b4] sm:$0xf0]  ;;  %v277_v51 = vperm.slane %v4143_v36, 0  ;;  %v278_v22 = vperm.slane %v4143_v36, 1 }
  0x8e   : > { %v2758_v53 = vor.u32 %v3112_v48, %v2757_v44  ;;  %v3105_v44 = vld [vmem:[%s4511_s4 + $0x184] sm:$0xf] }
  0x8f   : > { %1629 = vmatpush.bf16.msra.mxu0 %v2726_v37 }
  0x90   : > { %1657 = vmatpush.bf16.msra.mxu2 %v2730_v42  ;;  %1643 = vmatpush.bf16.msra.mxu1 %v2790_v52  ;;  %v3095_v42 = vld [vmem:[%s4511_s4 + $0x134] sm:$0xf] }
  0x91   : > { %1671 = vmatpush.bf16.msra.mxu3 %v2794_v57  ;;  %v2698_v47 = vor.u32 %v3095_v42, %v2695_v43  ;;  %v2685_v57 = vld [vmem:[%s4511_s4 + $0x120] sm:$0xf]  ;;  %v3106_v43 = vld [vmem:[%s4511_s4 + $0x184] sm:$0xf0] }
  0x92   : > { %v2734_v48 = vor.u32 %v3106_v43, %v2733_v39  ;;  %v3149_v39 = vld [vmem:[%s4511_s4 + $0x2e4] sm:$0xf]  ;;  %v3132_v43 = vld [vmem:[%s4511_s4 + $0x254] sm:$0xf0] }
  0x93   : > { %1630 = vmatpush.bf16.msra.mxu0 %v2718_v58  ;;  %v3094_v58 = vld [vmem:[%s4511_s4 + $0x124] sm:$0xf0] }
  0x94   : > { %1658 = vmatpush.bf16.msra.mxu2 %v2722_v63  ;;  %1644 = vmatpush.bf16.msra.mxu1 %v2782_v3  ;;  %v2686_v61 = vor.u32 %v3094_v58, %v2685_v57  ;;  %v2754_v3 = vor.u32 %v3109_v1, %v2751_v2  ;;  %v1122_v2 = vlaneseq }
  0x95   : > { %1672 = vmatpush.bf16.msra.mxu3 %v2786_v4 }
  0x96   : > { %vm4269_vm3 = vcmp.lt.s32.totalorder %v1122_v2, 256 }
  0x97   : > { %1631 = vmatpush.bf16.msra.mxu0 %v2710_v59  ;;  %v3091_v59 = vld [vmem:[%s4511_s4 + $0x114] sm:$0xf] }
  0x98   : > { %1659 = vmatpush.bf16.msra.mxu2 %v2714_v9  ;;  %1645 = vmatpush.bf16.msra.mxu1 %v2774_v17  ;;  %v2678_v9 = vor.u32 %v3092_v18, %v2677_v15 }
  0x99   : > { %1673 = vmatpush.bf16.msra.mxu3 %v2778_v20  ;;  %v3107_v20 = vld [vmem:[%s4511_s4 + $0x194] sm:$0xf] }
  0x9a   : > { %v2746_v25 = vor.u32 %v3107_v20, %v2743_v21  ;;  %v2951_v20 = vld [vmem:[%s4511_s4 + $0x2f8] sm:$0xf0]  ;;  %v2877_v21 = vld [vmem:[%s4511_s4 + $0x260] sm:$0xf] }
  0x9b   : > { %1632 = vmatpush.bf16.msra.mxu0 %v2702_v24 }
  0x9c   : > { %1660 = vmatpush.bf16.msra.mxu2 %v2706_v29  ;;  %1646 = vmatpush.bf16.msra.mxu1 %v2766_v30  ;;  %v2669_v29 = vld [vmem:[%s4511_s4 + $0x100] sm:$0xf]  ;;  %v3090_v30 = vld [vmem:[%s4511_s4 + $0x104] sm:$0xf0] }
  0x9d   : > { %1674 = vmatpush.bf16.msra.mxu3 %v2770_v35 }
  0x9f   : > { %1633 = vmatpush.bf16.msra.mxu0 %v2694_v40 }
  0xa0   : > { %1661 = vmatpush.bf16.msra.mxu2 %v2698_v47  ;;  %1647 = vmatpush.bf16.msra.mxu1 %v2758_v53 }
  0xa1   : > { %1675 = vmatpush.bf16.msra.mxu3 %v2762_v55 }
  0xa3   : > { %1634 = vmatpush.bf16.msra.mxu0 %v2686_v61 }
  0xa5   : > { %1676 = vmatpush.bf16.msra.mxu3 %v2754_v3 }
  0xa7   : > { %1635 = vmatpush.bf16.msra.mxu0 %v2678_v9 }
  0xa9   : > { %1677 = vmatpush.bf16.msra.mxu3 %v2746_v25 }
  0xad   : > { %v3973_v8 = vpop.f32.mrf.mxu0 }
  0xae   : > { %v3984_v13 = vpop.f32.mrf.mxu1 }
  0xaf   : > { %v507_v56 = vadd.f32 %v3984_v13, %v3973_v8  ;;  %v2687_v8 = vld [vmem:[%s4511_s4 + $0x128] sm:$0xf0]  ;;  %v2749_v13 = vld [vmem:[%s4511_s4 + $0x1a0] sm:$0xf] }
  0xb0   : > { %v2690_v63 = vor.u32 %v3093_v60, %v2687_v8  ;;  %v2750_v0 = vor.u32 %v3110_v62, %v2749_v13 }
  0xb1   : > { %v4004_v27 = vpop.f32.mrf.mxu2  ;;  %v539_v4 = vadd.f32 %v507_v56, %v277_v51 }
  0xb2   : > { %1662 = vmatpush.bf16.msra.mxu2 %v2690_v63  ;;  %1648 = vmatpush.bf16.msra.mxu1 %v2750_v0 }
  0xb4   : > { %v4015_v31 = vpop.f32.mrf.mxu3 }
  0xb5   : > { %v4035_v41 = vpop.f32.mrf.mxu0  ;;  %v535_v23 = vadd.f32 %v4015_v31, %v4004_v27  ;;  %v2670_v27 = vor.u32 %v3090_v30, %v2669_v29  ;;  %v2671_v31 = vld [vmem:[%s4511_s4 + $0x108] sm:$0xf0] }
  0xb6   : > { %v4046_v46 = vpop.f32.mrf.mxu1  ;;  %1649 = vmatpush.bf16.msra.mxu1 %v2742_v19  ;;  %v2674_v38 = vor.u32 %v3089_v32, %v2671_v31  ;;  %v3151_v19 = vld [vmem:[%s4511_s4 + $0x2f4] sm:$0xf]  ;;  %v2879_v32 = vld [vmem:[%s4511_s4 + $0x268] sm:$0xf0] }
  0xb7   : > { %v509_v33 = vadd.f32 %v4046_v46, %v4035_v41  ;;  %v540_v40 = vadd.f32 %v535_v23, %v278_v22  ;;  %1636 = vmatpush.bf16.msra.mxu0 %v2670_v27  ;;  %v2735_v41 = vld [vmem:[%s4511_s4 + $0x188] sm:$0xf0]  ;;  %v2941_v27 = vld [vmem:[%s4511_s4 + $0x2e0] sm:$0xf] }
  0xb9   : > { %v4084_v5 = vpop.f32.mrf.mxu2  ;;  %v541_v49 = vadd.f32 %v509_v33, %v277_v51 }
  0xba   : > { %1650 = vmatpush.bf16.msra.mxu1 %v2734_v48 }
  0xbc   : > { %v4095_v54 = vpop.f32.mrf.mxu3 }
  0xca   : > { %v4100_v10 = vpop.f32.mrf.mxu0 }
  0xcb   : > { %v791_v16 = vpop.f32.mrf.mxu1 }
  0xcc   : > { %v792_v6 = vadd.f32 %v791_v16, %v4100_v10  ;;  %v2679_v10 = vld [vmem:[%s4511_s4 + $0x118] sm:$0xf0] }
  0xcd   : > { %v2682_v17 = vor.u32 %v3091_v59, %v2679_v10  ;;  %v2885_v10 = vld [vmem:[%s4511_s4 + $0x270] sm:$0xf] }
  0xce   : > { %v824_v26 = vadd.f32 %v792_v6, %v539_v4 }
  0xcf   : > { %1663 = vmatpush.bf16.msra.mxu2 %v2682_v17  ;;  %v3152_v17 = vld [vmem:[%s4511_s4 + $0x2f4] sm:$0xf0] }
  0xd2   : > { %v4162_v45 = vpop.f32.mrf.mxu0 }
  0xd3   : > { %v4138_v34 = vpop.f32.mrf.mxu2  ;;  %v4174_v52 = vpop.f32.mrf.mxu1  ;;  %1664 = vmatpush.bf16.msra.mxu2 %v2674_v38  ;;  %v3150_v38 = vld [vmem:[%s4511_s4 + $0x2e4] sm:$0xf0] }
  0xd4   : > { %v4145_v37 = vpop.f32.mrf.mxu3  ;;  %v794_v46 = vadd.f32 %v4174_v52, %v4162_v45  ;;  %v537_v52 = vadd.f32 %v4095_v54, %v4084_v5  ;;  %v3145_v54 = vld [vmem:[%s4511_s4 + $0x2c4] sm:$0xf] }
  0xd5   : > { %v820_v42 = vadd.f32 %v4145_v37, %v4138_v34  ;;  %v2738_v34 = vor.u32 %v3105_v44, %v2735_v41 }
  0xd6   : > { %v826_v60 = vadd.f32 %v794_v46, %v541_v49  ;;  %v542_v62 = vadd.f32 %v537_v52, %v278_v22  ;;  %v3134_v22 = vld [vmem:[%s4511_s4 + $0x264] sm:$0xf0]  ;;  %v2935_v52 = vld [vmem:[%s4511_s4 + $0x2d8] sm:$0xf0] }
  0xd7   : > { %1678 = vmatpush.bf16.msra.mxu3 %v2738_v34  ;;  %v825_v56 = vadd.f32 %v820_v42, %v540_v40  ;;  %v2943_v40 = vld [vmem:[%s4511_s4 + $0x2e8] sm:$0xf0]  ;;  %v2869_v42 = vld [vmem:[%s4511_s4 + $0x250] sm:$0xf]  ;;  %v3131_v34 = vld [vmem:[%s4511_s4 + $0x254] sm:$0xf] }
  0xdb   : > { %v807_v7 = vpop.f32.mrf.mxu2 }
  0xdc   : > { %v821_v14 = vpop.f32.mrf.mxu3 }
  0xdd   : > { %v822_v13 = vadd.f32 %v821_v14, %v807_v7  ;;  %v2887_v14 = vld [vmem:[%s4511_s4 + $0x278] sm:$0xf0] }
  0xde   : > { %v2890_v25 = vor.u32 %v3135_v12, %v2887_v14  ;;  %v3128_v12 = vld [vmem:[%s4511_s4 + $0x234] sm:$0xf0] }
  0xdf   : > { %v827_v4 = vadd.f32 %v822_v13, %v542_v62  ;;  %v2861_v13 = vld [vmem:[%s4511_s4 + $0x240] sm:$0xf]  ;;  %v3130_v62 = vld [vmem:[%s4511_s4 + $0x244] sm:$0xf0] }
  0xea   : > { %v1039_v16 = vpop.f32.mrf.mxu0 }
  0xeb   : > { %v1053_v24 = vpop.f32.mrf.mxu1 }
  0xec   : > { %v1054_v28 = vadd.f32 %v1053_v24, %v1039_v16  ;;  %v2949_v16 = vld [vmem:[%s4511_s4 + $0x2f0] sm:$0xf]  ;;  %v2886_v24 = vor.u32 %v3136_v11, %v2885_v10 }
  0xed   : > { %v2950_v33 = vor.u32 %v3152_v17, %v2949_v16  ;;  %v2853_v11 = vld [vmem:[%s4511_s4 + $0x230] sm:$0xf]  ;;  %v3127_v17 = vld [vmem:[%s4511_s4 + $0x234] sm:$0xf] }
  0xee   : > { %v1086_v35 = vadd.f32 %v1054_v28, %v824_v26  ;;  %v3133_v28 = vld [vmem:[%s4511_s4 + $0x264] sm:$0xf] }
  0xef   : > { %v2882_v48 = vor.u32 %v3133_v28, %v2879_v32  ;;  %v3143_v28 = vld [vmem:[%s4511_s4 + $0x2b4] sm:$0xf] }
  0xf0   : > { %v1090_v47 = vmax.f32 %v1086_v35, 0.0  ;;  %v2954_v35 = vor.u32 %v3151_v19, %v2951_v20  ;;  %v2855_v19 = vld [vmem:[%s4511_s4 + $0x238] sm:$0xf0]  ;;  %v2917_v20 = vld [vmem:[%s4511_s4 + $0x2b0] sm:$0xf] }
  0xf1   : > { %v1067_v37 = vpop.f32.mrf.mxu2  ;;  %v2858_v32 = vor.u32 %v3127_v17, %v2855_v19 }
  0xf2   : > { %v1099_v50 = vrot.slane %v1090_v47, 7  ;;  %1117 = vst [vmem:[#allocation1] sm:$0xff] %v1090_v47  ;;  %v1081_v53 = vpop.f32.mrf.mxu3  ;;  %v1041_v55 = vpop.f32.mrf.mxu0  ;;  %v2878_v47 = vor.u32 %v3134_v22, %v2877_v21 }
  0xf3   : > { %v1082_v57 = vadd.f32 %v1081_v53, %v1067_v37  ;;  %v1055_v58 = vpop.f32.mrf.mxu1  ;;  %v2871_v37 = vld [vmem:[%s4511_s4 + $0x258] sm:$0xf0] }
  0xf4   : > { %1111 = vst [vmem:[#allocation2] sm:$0xfe] %v1099_v50  ;;  %v1056_v45 = vadd.f32 %v1055_v58, %v1041_v55  ;;  %v2946_v55 = vor.u32 %v3149_v39, %v2943_v40  ;;  %v3125_v39 = vld [vmem:[%s4511_s4 + $0x224] sm:$0xf]  ;;  %v2847_v40 = vld [vmem:[%s4511_s4 + $0x228] sm:$0xf0] }
  0xf5   : > { %v1087_v61 = vadd.f32 %v1082_v57, %v825_v56  ;;  %v2933_v56 = vld [vmem:[%s4511_s4 + $0x2d0] sm:$0xf] }
  0xf6   : > { %v1088_v8 = vadd.f32 %v1056_v45, %v826_v60  ;;  %v3148_v60 = vld [vmem:[%s4511_s4 + $0x2d4] sm:$0xf0]  ;;  %v3147_v45 = vld [vmem:[%s4511_s4 + $0x2d4] sm:$0xf] }
  0xf7   : > { %v1091_v36 = vmax.f32 %v1087_v61, 0.0  ;;  %v2870_v61 = vor.u32 %v3132_v43, %v2869_v42  ;;  %v2938_v2 = vor.u32 %v3147_v45, %v2935_v52  ;;  %v3140_v45 = vld [vmem:[%s4511_s4 + $0x294] sm:$0xf0]  ;;  %v3139_v52 = vld [vmem:[%s4511_s4 + $0x294] sm:$0xf] }
  0xf8   : > { %v1092_v51 = vmax.f32 %v1088_v8, 0.0  ;;  %v2874_v8 = vor.u32 %v3131_v34, %v2871_v37 }
  0xf9   : > { %v1100_v63 = vrot.slane %v1091_v36, 7  ;;  %1118 = vst [vmem:[#allocation1 + $0x9] sm:$0xff] %v1091_v36  ;;  %v1069_v0 = vpop.f32.mrf.mxu2 }
  0xfa   : > { %v1101_v1 = vrot.slane %v1092_v51, 7  ;;  %v1083_v3 = vpop.f32.mrf.mxu3 }
  0xfb   : > { %1112 = vst [vmem:[#allocation2 + $0x8] sm:$0xfe] %v1100_v63  ;;  %v1084_v6 = vadd.f32 %v1083_v3, %v1069_v0  ;;  %v1400_v31 = vld [vmem:[#allocation2] sm:$0xfe] }
  0xfc   : > { %v4267_v15 = vsel %vm1098_vm2, %v1099_v50, %v1101_v1  ;;  %1115 = vst [vmem:[#allocation2 + $0x20] sm:$0x1] %v1101_v1  ;;  %v2942_v50 = vor.u32 %v3150_v38, %v2941_v27  ;;  %v2863_v0 = vld [vmem:[%s4511_s4 + $0x248] sm:$0xf0]  ;;  %v2934_v1 = vor.u32 %v3148_v60, %v2933_v56  ;;  %v3126_v38 = vld [vmem:[%s4511_s4 + $0x224] sm:$0xf0] }
  0xfd   : > { %v1089_v5 = vadd.f32 %v1084_v6, %v827_v4  ;;  %v1406_v49 = vpack.c.bf16 %v4267_v15, %v1400_v31  ;;  %v2925_v4 = vld [vmem:[%s4511_s4 + $0x2c0] sm:$0xf]  ;;  %v3146_v6 = vld [vmem:[%s4511_s4 + $0x2c4] sm:$0xf0]  ;;  %v2839_v56 = vld [vmem:[%s4511_s4 + $0x218] sm:$0xf0] }
  0xfe   : > { %v2926_v16 = vor.u32 %v3146_v6, %v2925_v4  ;;  %v2901_v60 = vld [vmem:[%s4511_s4 + $0x290] sm:$0xf] }
  0xff   : > { %v1093_v18 = vmax.f32 %v1089_v5, 0.0  ;;  %v1446_v36 = vshll.u32 %v1406_v49, 16  ;;  %v1444_v21 = vshrl.u32 %v1406_v49, 16  ;;  %v2850_v49 = vor.u32 %v3125_v39, %v2847_v40  ;;  %v1136_v40 = vld [vmem:[%s4512_s5] sm:$0x3] }
 0x100   : > { %v1120_v59 = vld [vmem:[#allocation1 + $0x1] ss:$9 sm:$0xff] }
 0x101   : > { %1126 = vst.msk [vmem:[#allocation2] ss:$8 sm:$0x3] %vm4269_vm3, %v1120_v59  ;;  %v1103_v7 = vrot.slane %v1093_v18, 7  ;;  %v2862_v59 = vor.u32 %v3130_v62, %v2861_v13  ;;  %v1448_v10 = vrot.slane %v1446_v36, 1 }
 0x102   : > { %1128 = vst [vmem:[#allocation1] sm:$0xff] %v1092_v51  ;;  %v1401_v41 = vld [vmem:[#allocation2 + $0x8] sm:$0xfe]  ;;  %v3122_v62 = vld [vmem:[%s4511_s4 + $0x204] sm:$0xf0] }
 0x103   : > { %v4276_v9 = vsel %vm1098_vm2, %v1100_v63, %v1103_v7  ;;  %1116 = vst [vmem:[#allocation2 + $0x28] sm:$0x1] %v1103_v7  ;;  %v1404_v44 = vld [vmem:[#allocation2 + $0x20] sm:$0x1]  ;;  %v3129_v63 = vld [vmem:[%s4511_s4 + $0x244] sm:$0xf] }
 0x104   : > { %1129 = vst [vmem:[#allocation1 + $0x9] sm:$0xff] %v1093_v18  ;;  %v1408_v57 = vpack.c.bf16 %v1404_v44, %v1404_v44  ;;  %v1407_v58 = vpack.c.bf16 %v4276_v9, %v1401_v41  ;;  %v2927_v18 = vld [vmem:[%s4511_s4 + $0x2c8] sm:$0xf0]  ;;  %v2866_v7 = vor.u32 %v3129_v63, %v2863_v0  ;;  %v2909_v41 = vld [vmem:[%s4511_s4 + $0x2a0] sm:$0xf] }
 0x105   : > { %v3121_v63 = vld [vmem:[%s4511_s4 + $0x204] sm:$0xf]  ;;  %v2831_v0 = vld [vmem:[%s4511_s4 + $0x208] sm:$0xf0] }
 0x106   : > { %v1451_v3 = vshll.u32 %v1408_v57, 16  ;;  %v1458_v5 = vshll.u32 %v1407_v58, 16  ;;  %v1456_v27 = vshrl.u32 %v1407_v58, 16 }
 0x108   : > { %v1142_v23 = vld [vmem:[#allocation2] sm:$0xff]  ;;  %v1143_v26 = vld [vmem:[#allocation2 + $0x8] sm:$0xff]  ;;  %v1453_v22 = vrot.slane %v1451_v3, 1  ;;  %v2902_v3 = vor.u32 %v3140_v45, %v2901_v60 }
 0x109   : > { %v1146_v29 = vpack.c.bf16 %v4267_v15, %v1142_v23  ;;  %v1147_v30 = vpack.c.bf16 %v4276_v9, %v1143_v26  ;;  %v2930_v23 = vor.u32 %v3145_v54, %v2927_v18  ;;  %v2854_v26 = vor.u32 %v3128_v12, %v2853_v11  ;;  %v3138_v54 = vld [vmem:[%s4511_s4 + $0x284] sm:$0xf0] }
 0x10a   : > { %v1405_v53 = vld [vmem:[#allocation2 + $0x28] sm:$0x1]  ;;  %v2834_v11 = vor.u32 %v3121_v63, %v2831_v0  ;;  %v1963_v0 = vld [vmem:[%s4489_s9 + $0x8] sm:$0xff] }
 0x10b   : > { %1348 = vmatmul.bf16.vlgmr.msrb.gmra.mxu0 %v1146_v29  ;;  %1376 = vmatmul.bf16.vlgmr.msrb.gmra.mxu2 %v1146_v29  ;;  %v1131_v46 = vld [vmem:[#allocation1 + $0x6] ss:$9 sm:$0xff]  ;;  %v1409_v51 = vpack.c.bf16 %v1405_v53, %v1405_v53 }
 0x10c   : > { %1902 = vmatpush.bf16.msrb.mxu0 %v2886_v24  ;;  %1930 = vmatpush.bf16.msrb.mxu2 %v2890_v25  ;;  %1134 = vst.msk [vmem:[#allocation2 + $0x21] ss:$8 sm:$0x3] %vm4269_vm3, %v1131_v46  ;;  %v1460_v24 = vrot.slane %v1458_v5, 1  ;;  %v3144_v25 = vld [vmem:[%s4511_s4 + $0x2b4] sm:$0xf0] }
 0x10d   : > { %1362 = vmatmul.bf16.vlgmr.msrb.gmra.mxu1 %v1147_v30  ;;  %1390 = vmatmul.bf16.vlgmr.msrb.gmra.mxu3 %v1147_v30  ;;  %v1463_v14 = vshll.u32 %v1409_v51, 16  ;;  %v2919_v29 = vld [vmem:[%s4511_s4 + $0x2b8] sm:$0xf0]  ;;  %v1449_v30 = vor.u32 %v1448_v10, %v1444_v21  ;;  %v3142_v46 = vld [vmem:[%s4511_s4 + $0x2a4] sm:$0xf0] }
 0x10e   : > { %1916 = vmatpush.bf16.msrb.mxu1 %v2950_v33  ;;  %1944 = vmatpush.bf16.msrb.mxu3 %v2954_v35  ;;  %v2845_v33 = vld [vmem:[%s4511_s4 + $0x220] sm:$0xf]  ;;  %v2918_v35 = vor.u32 %v3144_v25, %v2917_v20  ;;  %v1461_v43 = vor.u32 %v1460_v24, %v1456_v27  ;;  %v2922_v44 = vor.u32 %v3143_v28, %v2919_v29  ;;  %v3124_v53 = vld [vmem:[%s4511_s4 + $0x214] sm:$0xf0]  ;;  %v1690_v10 = vld [vmem:[#allocation2 + $0x8] sm:$0xfc] }
 0x10f   : > { %v1465_v31 = vrot.slane %v1463_v14, 1  ;;  %v1454_v42 = vsel %vm581_vm0, %v1449_v30, %v1453_v22  ;;  %v2846_v37 = vor.u32 %v3126_v38, %v2845_v33  ;;  %v2910_v57 = vor.u32 %v3142_v46, %v2909_v41  ;;  %v2829_v51 = vld [vmem:[%s4511_s4 + $0x200] sm:$0xf] }
 0x110   : > { %1903 = vmatpush.bf16.msrb.mxu0 %v2878_v47  ;;  %1931 = vmatpush.bf16.msrb.mxu2 %v2882_v48  ;;  %v3141_v47 = vld [vmem:[%s4511_s4 + $0x2a4] sm:$0xf]  ;;  %v2911_v48 = vld [vmem:[%s4511_s4 + $0x2a8] sm:$0xf0]  ;;  %v2893_v5 = vld [vmem:[%s4511_s4 + $0x280] sm:$0xf]  ;;  %v2830_v18 = vor.u32 %v3122_v62, %v2829_v51  ;;  %v1694_v20 = vpack.c.bf16 %v4276_v9, %v1690_v10 }
 0x111   : > { %v1466_v34 = vsel %vm581_vm0, %v1461_v43, %v1465_v31  ;;  %v2914_v58 = vor.u32 %v3141_v47, %v2911_v48  ;;  %v2894_v17 = vor.u32 %v3138_v54, %v2893_v5  ;;  %v1138_v43 = vperm.slane %v1136_v40, 0  ;;  %v1964_v5 = vld [vmem:[%s4489_s9 + $0x10] sm:$0xff] }
 0x112   : > { %1917 = vmatpush.bf16.msrb.mxu1 %v2942_v50  ;;  %1945 = vmatpush.bf16.msrb.mxu3 %v2946_v55  ;;  %v2837_v50 = vld [vmem:[%s4511_s4 + $0x210] sm:$0xf]  ;;  %v3123_v55 = vld [vmem:[%s4511_s4 + $0x214] sm:$0xf]  ;;  %v1737_v24 = vrot.slane %v1694_v20, 1 }
 0x113   : > { %v2838_v13 = vor.u32 %v3124_v53, %v2837_v50  ;;  %v2842_v36 = vor.u32 %v3123_v55, %v2839_v56  ;;  %v1962_v56 = vld [vmem:[%s4489_s9] sm:$0xff] }
 0x114   : > { %1904 = vmatpush.bf16.msrb.mxu0 %v2870_v61  ;;  %1932 = vmatpush.bf16.msrb.mxu2 %v2874_v8  ;;  %v2903_v61 = vld [vmem:[%s4511_s4 + $0x298] sm:$0xf0]  ;;  %v1691_v8 = vld [vmem:[#allocation2 + $0x20] sm:$0x3] }
 0x115   : > { %v2906_v4 = vor.u32 %v3139_v52, %v2903_v61  ;;  %v1695_v6 = vpack.c.bf16 %v1691_v8, %v1691_v8 }
 0x116   : > { %1918 = vmatpush.bf16.msrb.mxu1 %v2934_v1  ;;  %1946 = vmatpush.bf16.msrb.mxu3 %v2938_v2  ;;  %v1689_v1 = vld [vmem:[#allocation2] sm:$0xfc]  ;;  %v1692_v2 = vld [vmem:[#allocation2 + $0x28] sm:$0x3] }
 0x117   : > { %v1693_v12 = vpack.c.bf16 %v4267_v15, %v1689_v1  ;;  %v1696_v14 = vpack.c.bf16 %v1692_v2, %v1692_v2 }
 0x118   : > { %1905 = vmatpush.bf16.msrb.mxu0 %v2862_v59  ;;  %1933 = vmatpush.bf16.msrb.mxu2 %v2866_v7  ;;  %v3137_v59 = vld [vmem:[%s4511_s4 + $0x284] sm:$0xf]  ;;  %v2895_v7 = vld [vmem:[%s4511_s4 + $0x288] sm:$0xf0] }
 0x119   : > { %v2898_v19 = vor.u32 %v3137_v59, %v2895_v7  ;;  %v1734_v21 = vrot.slane %v1693_v12, 1  ;;  %v1738_v22 = vrot.slane %v1696_v14, 1 }
 0x11a   : > { %1919 = vmatpush.bf16.msrb.mxu1 %v2926_v16  ;;  %1947 = vmatpush.bf16.msrb.mxu3 %v2930_v23  ;;  %v1735_v16 = vrot.slane %v1695_v6, 1 }
 0x11b   : > { %1637 = vmatmul.bf16.vlgmr.msra.gmra.mxu0 %v1454_v42  ;;  %1665 = vmatmul.bf16.vlgmr.msra.gmra.mxu2 %v1454_v42  ;;  %v1739_v15 = vsel %vm861_vm1, %v1737_v24, %v1738_v22 }
 0x11c   : > { %1906 = vmatpush.bf16.msrb.mxu0 %v2854_v26  ;;  %1934 = vmatpush.bf16.msrb.mxu2 %v2858_v32  ;;  %v1736_v23 = vsel %vm861_vm1, %v1734_v21, %v1735_v16 }
 0x11d   : > { %1651 = vmatmul.bf16.vlgmr.msra.gmra.mxu1 %v1466_v34  ;;  %1679 = vmatmul.bf16.vlgmr.msra.gmra.mxu3 %v1466_v34 }
 0x11e   : > { %1920 = vmatpush.bf16.msrb.mxu1 %v2918_v35  ;;  %1948 = vmatpush.bf16.msrb.mxu3 %v2922_v44 }
 0x120   : > { %1907 = vmatpush.bf16.msrb.mxu0 %v2846_v37  ;;  %1935 = vmatpush.bf16.msrb.mxu2 %v2850_v49  ;;  %v1139_v49 = vperm.slane %v1136_v40, 1 }
 0x122   : > { %1921 = vmatpush.bf16.msrb.mxu1 %v2910_v57  ;;  %1949 = vmatpush.bf16.msrb.mxu3 %v2914_v58 }
 0x124   : > { %1908 = vmatpush.bf16.msrb.mxu0 %v2838_v13  ;;  %1936 = vmatpush.bf16.msrb.mxu2 %v2842_v36 }
 0x126   : > { %1922 = vmatpush.bf16.msrb.mxu1 %v2902_v3  ;;  %1950 = vmatpush.bf16.msrb.mxu3 %v2906_v4 }
 0x128   : > { %1909 = vmatpush.bf16.msrb.mxu0 %v2830_v18  ;;  %1937 = vmatpush.bf16.msrb.mxu2 %v2834_v11 }
 0x12a   : > { %1923 = vmatpush.bf16.msrb.mxu1 %v2894_v17  ;;  %1951 = vmatpush.bf16.msrb.mxu3 %v2898_v19  ;;  %v1965_v17 = vld [vmem:[%s4489_s9 + $0x18] sm:$0xff] }
 0x12b   : > { %1910 = vmatmul.bf16.vlgmr.msrb.gmra.mxu0 %v1736_v23  ;;  %1938 = vmatmul.bf16.vlgmr.msrb.gmra.mxu2 %v1736_v23 }
 0x12d   : > { %1924 = vmatmul.bf16.vlgmr.msrb.gmra.mxu1 %v1739_v15  ;;  %1952 = vmatmul.bf16.vlgmr.msrb.gmra.mxu3 %v1739_v15 }
 0x188   : > { %v1349_v25 = vpop.f32.mrf.mxu0 }
 0x18a   : > { %v1363_v26 = vpop.f32.mrf.mxu1 }
 0x18b   : > { %v1364_v44 = vadd.f32 %v1363_v26, %v1349_v25 }
 0x18d   : > { %v1396_v34 = vadd.f32 %v1364_v44, %v1138_v43 }
 0x18e   : > { %v1377_v28 = vpop.f32.mrf.mxu2 }
 0x190   : > { %v1351_v9 = vpop.f32.mrf.mxu0  ;;  %v1391_v29 = vpop.f32.mrf.mxu3 }
 0x191   : > { %v1392_v50 = vadd.f32 %v1391_v29, %v1377_v28 }
 0x192   : > { %v1365_v30 = vpop.f32.mrf.mxu1 }
 0x193   : > { %v1366_v57 = vadd.f32 %v1365_v30, %v1351_v9  ;;  %v1397_v52 = vadd.f32 %v1392_v50, %v1139_v49 }
 0x195   : > { %v1398_v51 = vadd.f32 %v1366_v57, %v1138_v43 }
 0x196   : > { %v1379_v32 = vpop.f32.mrf.mxu2 }
 0x198   : > { %v1638_v27 = vpop.f32.mrf.mxu0  ;;  %v1393_v31 = vpop.f32.mrf.mxu3 }
 0x199   : > { %v1394_v2 = vadd.f32 %v1393_v31, %v1379_v32 }
 0x19a   : > { %v1652_v33 = vpop.f32.mrf.mxu1 }
 0x19b   : > { %v1653_v46 = vadd.f32 %v1652_v33, %v1638_v27  ;;  %v1399_v10 = vadd.f32 %v1394_v2, %v1139_v49 }
 0x19d   : > { %v1685_v53 = vadd.f32 %v1653_v46, %v1396_v34 }
 0x19e   : > { %v1666_v35 = vpop.f32.mrf.mxu2 }
 0x1a0   : > { %v1640_v38 = vpop.f32.mrf.mxu0  ;;  %v1680_v39 = vpop.f32.mrf.mxu3 }
 0x1a1   : > { %v1681_v58 = vadd.f32 %v1680_v39, %v1666_v35 }
 0x1a2   : > { %v1654_v42 = vpop.f32.mrf.mxu1 }
 0x1a3   : > { %v1655_v61 = vadd.f32 %v1654_v42, %v1640_v38  ;;  %v1686_v62 = vadd.f32 %v1681_v58, %v1397_v52 }
 0x1a5   : > { %v1687_v3 = vadd.f32 %v1655_v61, %v1398_v51 }
 0x1a6   : > { %v1668_v41 = vpop.f32.mrf.mxu2 }
 0x1a8   : > { %v1911_v47 = vpop.f32.mrf.mxu0  ;;  %v1682_v48 = vpop.f32.mrf.mxu3 }
 0x1a9   : > { %v1683_v54 = vadd.f32 %v1682_v48, %v1668_v41 }
 0x1aa   : > { %v1925_v37 = vpop.f32.mrf.mxu1 }
 0x1ab   : > { %v1926_v55 = vadd.f32 %v1925_v37, %v1911_v47  ;;  %v1688_v14 = vadd.f32 %v1683_v54, %v1399_v10 }
 0x1ad   : > { %v1958_v60 = vadd.f32 %v1926_v55, %v1685_v53 }
 0x1ae   : > { %v1939_v45 = vpop.f32.mrf.mxu2 }
 0x1af   : > { %v1966_v8 = vadd.f32 %v1962_v56, %v1958_v60 }
 0x1b0   : > { %v1913_v13 = vpop.f32.mrf.mxu0  ;;  %v1953_v36 = vpop.f32.mrf.mxu3 }
 0x1b1   : > { %1970 = vst [vmem:[%s4495_s11] sm:$0xff] %v1966_v8  ;;  %v1954_v63 = vadd.f32 %v1953_v36, %v1939_v45 }
 0x1b2   : > { %v1927_v1 = vpop.f32.mrf.mxu1 }
 0x1b3   : > { %v1959_v4 = vadd.f32 %v1954_v63, %v1686_v62  ;;  %v1928_v6 = vadd.f32 %v1927_v1, %v1913_v13 }
 0x1b5   : > { %v1967_v18 = vadd.f32 %v1963_v0, %v1959_v4  ;;  %v1960_v59 = vadd.f32 %v1928_v6, %v1687_v3 }
 0x1b6   : > { %v1941_v7 = vpop.f32.mrf.mxu2 }
 0x1b7   : > { %1971 = vst [vmem:[%s4495_s11 + $0x8] sm:$0xff] %v1967_v18  ;;  %v1968_v11 = vadd.f32 %v1964_v5, %v1960_v59 }
 0x1b8   : > { %v1955_v12 = vpop.f32.mrf.mxu3 }
 0x1b9   : > { %1972 = vst [vmem:[%s4495_s11 + $0x10] sm:$0xff] %v1968_v11  ;;  %v1956_v16 = vadd.f32 %v1955_v12, %v1941_v7 }
 0x1bb   : > { %v1961_v19 = vadd.f32 %v1956_v16, %v1688_v14 }
 0x1bd   : > { %v1969_v20 = vadd.f32 %v1965_v17, %v1961_v19 }
 0x1bf   : > { %1973 = vst [vmem:[%s4495_s11 + $0x18] sm:$0xff] %v1969_v20 }
 0x1c0 PF: > { %s16_s21 = sadd.s32 1, %s3168_s21  }
 0x1c1   : > { %p13_p4 = scmp.ge.s32.totalorder %s16_s21, 4  }
 0x1c3   :  { %15 = sbr.rel (!%p13_p4) target bundleno = 1 (0x1), region = 84 }

</bundles_post_ra>
